<compile_context>
chip_gen: v7x
topology: tpu7x:2x2x1
jax: 0.10.0
libtpu: 0.0.40
codegen_flags: <defaults>
</compile_context>

<pallas_src>
import jax
import jax.numpy as jnp
from jax import lax
from jax.experimental import pallas as pl
from jax.experimental.pallas import tpu as pltpu

# ---------------- module config (Encoder.__init__ args) ----------------------
IN_CHANNELS = 4
OUT_CHANNELS = 8        # hidden / output channels
NUM_LAYERS = 2          # number of ResidualBlocks
KERNEL_SIZE = 3

# bf16 MXU operands (f32 accumulation): ~3x fewer vmatmul passes on v6e/v7x.
# Set to jnp.float32 if exact (1e-4) agreement with the f32 reference is needed.
MXU_DTYPE = jnp.bfloat16


# ------------------------------ Pallas kernel --------------------------------
def _make_encoder_kernel(W, N, num_layers, ksize, cp, mxu_dtype):
    pad = ksize // 2
    taps = [(kh - pad, kw - pad) for kh in range(ksize) for kw in range(ksize)]

    def conv(x, w, bias, mask_ref, s_ref):
        # x:(cp,N) f32, w:(C, k*k*cp) mxu_dtype, bias:(C,1) f32
        # mask_ref:(k*k*cp, N) f32 (pre-broadcast over channels, resident VMEM)
        # s_ref:(k*k*cp, N) f32 VMEM scratch holding the assembled S matrix.
        for t, (dh, dw) in enumerate(taps):
            lo, hi = t * cp, (t + 1) * cp            # 8-row aligned f32 stores
            if dh == 0 and dw == 0:
                s_ref[lo:hi, :] = x                  # center tap: mask == 1
            else:
                d = dh * W + dw
                shifted = pltpu.roll(x, (-d) % N, 1)  # XLU lane rotation
                s_ref[lo:hi, :] = shifted * mask_ref[lo:hi, :]
        # Single MXU matmul per conv; bf16 operands, f32 accumulation.
        z = jnp.dot(w, s_ref[...].astype(mxu_dtype),
                    preferred_element_type=jnp.float32)
        return z + bias                              # (C,1) lane-broadcast add

    def kernel(x_ref, w_ref, b_ref, alpha_ref, mask_ref, o_ref, s_ref):
        def prelu(z, a):                             # a: SMEM scalar
            return jnp.where(z >= 0.0, z, a * z)

        # ---- init layer: Conv2d + PReLU ---------------------------------
        y = prelu(conv(x_ref[0], w_ref[0], b_ref[0], mask_ref, s_ref),
                  alpha_ref[0])
        # ---- residual blocks (statically unrolled) ----------------------
        for l in range(num_layers):
            r = prelu(conv(y, w_ref[2 * l + 1], b_ref[2 * l + 1],
                           mask_ref, s_ref), alpha_ref[2 * l + 1])
            r = prelu(conv(r, w_ref[2 * l + 2], b_ref[2 * l + 2],
                           mask_ref, s_ref), alpha_ref[2 * l + 2])
            y = y + r
        # ---- final conv (no activation) ---------------------------------
        out = conv(y, w_ref[2 * num_layers + 1], b_ref[2 * num_layers + 1],
                   mask_ref, s_ref)
        o_ref[0] = out.astype(o_ref.dtype)

    return kernel


# --------------------------------- wrapper ------------------------------------
def _pack_conv(w, b, cp, ksize, dtype):
    # PyTorch Conv2d weight (O, I, kh, kw), bias (O,)
    # -> (O, ksize*ksize*cp) matmul matrix, column order (kh, kw, c) matching
    #    the in-kernel S row order.  Bias is kept separate (added post-matmul).
    O, I = int(w.shape[0]), int(w.shape[1])
    w = jnp.pad(w, ((0, 0), (0, cp - I), (0, 0), (0, 0)))
    w_flat = jnp.transpose(w, (0, 2, 3, 1)).reshape(O, ksize * ksize * cp)
    return w_flat.astype(dtype), b.astype(jnp.float32)


def encoder_forward(x_nchw, params):
    B, Cin, H, W = x_nchw.shape
    C, L, KS = OUT_CHANNELS, NUM_LAYERS, KERNEL_SIZE
    P = H * W
    pad = KS // 2
    n_taps = KS * KS
    CP = ((max(Cin, C) + 7) // 8) * 8        # sublane-aligned channel width
    assert CP == C, "kernel assumes hidden width == 8-aligned padded input width"

    # Batch folding: 2 "parallel" grid steps keep both v7x TensorCores busy;
    # each step processes B//steps images folded onto the lane axis, which
    # amortizes per-step pipeline overhead on v5e/v6e (pure serial loop there).
    steps = 2 if (B % 2 == 0 and B >= 2) else 1
    Bs = B // steps
    N = Bs * P                               # lane extent per grid step
    n_convs = 2 * L + 2
    K = n_taps * CP                          # matmul contraction (no bias block)

    # NCHW -> per-step (CP, Bs*P) slabs: channels on sublanes, batch*pixels on
    # lanes (lane-dense; the tiny relayout is negligible XLA glue).
    x_flat = x_nchw.reshape(B, Cin, P).astype(jnp.float32)
    x_flat = jnp.pad(x_flat, ((0, 0), (0, CP - Cin), (0, 0)))
    x_flat = (x_flat.reshape(steps, Bs, CP, P)
              .transpose(0, 2, 1, 3).reshape(steps, CP, N))

    # Pack all 2L+2 convs into one resident weight stack (bf16) + f32 biases.
    packed = [_pack_conv(params["init_w"], params["init_b"], CP, KS, MXU_DTYPE)]
    for l in range(L):
        packed.append(_pack_conv(params[f"res{l}_w1"], params[f"res{l}_b1"],
                                 CP, KS, MXU_DTYPE))
        packed.append(_pack_conv(params[f"res{l}_w2"], params[f"res{l}_b2"],
                                 CP, KS, MXU_DTYPE))
    packed.append(_pack_conv(params["final_w"], params["final_b"], CP, KS,
                             MXU_DTYPE))
    w_all = jnp.stack([p[0] for p in packed], axis=0)             # (2L+2, C, K)
    b_all = jnp.stack([p[1] for p in packed], axis=0)[..., None]  # (2L+2, C, 1)

    alphas = jnp.stack(
        [params["init_a"].reshape(())]
        + [params[f"res{l}_a{j}"].reshape(()) for l in range(L) for j in (1, 2)]
    ).astype(jnp.float32)                                         # (1+2L,) SMEM

    # Boundary-validity masks ("same" zero padding), tiled over the Bs folded
    # images and pre-broadcast over channels host-side: row t*CP+c == tap t.
    hh = jnp.arange(P, dtype=jnp.int32) // W
    ww = jnp.arange(P, dtype=jnp.int32) % W
    rows = []
    for kh in range(KS):
        for kw in range(KS):
            dh, dw = kh - pad, kw - pad
            valid = ((hh + dh >= 0) & (hh + dh < H) &
                     (ww + dw >= 0) & (ww + dw < W))
            rows.append(valid.astype(jnp.float32))
    masks = jnp.stack(rows, axis=0)                    # (n_taps, P)
    masks = jnp.tile(masks, (1, Bs))                   # (n_taps, N)
    masks = jnp.repeat(masks, CP, axis=0)              # (n_taps*CP, N)

    # Scaling guard (review note): at 16x16 the working set is <1 MiB on every
    # generation, but this whole-slab-per-step design hits v7x's 64 MiB VMEM
    # first if H*W grows ~1000x; W-aligned lane tiling with per-tile halo masks
    # would then be required.
    vmem_bytes = 4 * N * (4 * CP + 3 * K + 4 * C)
    if vmem_bytes > 24 * 1024 * 1024:
        raise NotImplementedError(
            "Encoder kernel needs spatial lane tiling at this resolution")

    flops = 2 * B * P * C * K * n_convs
    bytes_accessed = int(x_flat.size * 4 + w_all.size * w_all.dtype.itemsize
                         + b_all.size * 4 + masks.size * 4 + alphas.size * 4
                         + steps * C * N * 4)

    kernel = _make_encoder_kernel(W, N, L, KS, CP, MXU_DTYPE)

    out = pl.pallas_call(
        kernel,
        out_shape=jax.ShapeDtypeStruct((steps, C, N), jnp.float32),
        grid=(steps,),
        in_specs=[
            pl.BlockSpec((1, CP, N), lambda s: (s, 0, 0)),          # x slab
            pl.BlockSpec((n_convs, C, K), lambda s: (0, 0, 0)),     # weights
            pl.BlockSpec((n_convs, C, 1), lambda s: (0, 0, 0)),     # biases
            pl.BlockSpec(memory_space=pltpu.MemorySpace.SMEM),      # PReLU alphas
            pl.BlockSpec((K, N), lambda s: (0, 0)),                 # masks
        ],
        out_specs=pl.BlockSpec((1, C, N), lambda s: (s, 0, 0)),
        scratch_shapes=[pltpu.VMEM((K, N), jnp.float32)],           # S matrix
        compiler_params=pltpu.CompilerParams(
            dimension_semantics=("parallel",)),                     # v7x: 2 TCs
        cost_estimate=pl.CostEstimate(
            flops=flops, transcendentals=0, bytes_accessed=bytes_accessed),
    )(x_flat, w_all, b_all, alphas, masks)

    # (steps, C, Bs*P) -> NCHW (for Bs == 1 the transpose is a no-op reshape).
    out = (out.reshape(steps, C, Bs, P)
           .transpose(0, 2, 1, 3).reshape(B, C, H, W))
    return out


# ---------------------------- pure-JAX reference ------------------------------
def encoder_reference(x_nchw, params):
    pad = KERNEL_SIZE // 2

    def conv(x, w, b):
        y = lax.conv_general_dilated(
            x, w, window_strides=(1, 1),
            padding=((pad, pad), (pad, pad)),
            dimension_numbers=("NCHW", "OIHW", "NCHW"))
        return y + b.reshape(1, -1, 1, 1)

    def prelu(x, a):
        return jnp.where(x >= 0, x, a.reshape(()) * x)

    y = prelu(conv(x_nchw, params["init_w"], params["init_b"]), params["init_a"])
    for l in range(NUM_LAYERS):
        r = prelu(conv(y, params[f"res{l}_w1"], params[f"res{l}_b1"]),
                  params[f"res{l}_a1"])
        r = prelu(conv(r, params[f"res{l}_w2"], params[f"res{l}_b2"]),
                  params[f"res{l}_a2"])
        y = y + r
    return conv(y, params["final_w"], params["final_b"])


# ------------------------------------ main -------------------------------------
if __name__ == "__main__":
    key = jax.random.PRNGKey(0)
    keys = jax.random.split(key, 16)
    C, Cin, KS, L = OUT_CHANNELS, IN_CHANNELS, KERNEL_SIZE, NUM_LAYERS

    def wkey(i, shape):
        return 0.1 * jax.random.normal(keys[i], shape, jnp.float32)

    params = {
        "init_w": wkey(0, (C, Cin, KS, KS)),
        "init_b": wkey(1, (C,)),
        "init_a": jnp.array([0.25], jnp.float32),     # nn.PReLU() default init
        "final_w": wkey(2, (C, C, KS, KS)),
        "final_b": wkey(3, (C,)),
    }
    ki = 4
    prelu_vals = [0.20, 0.30, 0.15, 0.35]             # distinct per-module alphas
    for l in range(L):
        params[f"res{l}_w1"] = wkey(ki, (C, C, KS, KS)); ki += 1
        params[f"res{l}_b1"] = wkey(ki, (C,)); ki += 1
        params[f"res{l}_w2"] = wkey(ki, (C, C, KS, KS)); ki += 1
        params[f"res{l}_b2"] = wkey(ki, (C,)); ki += 1
        params[f"res{l}_a1"] = jnp.array([prelu_vals[2 * l]], jnp.float32)
        params[f"res{l}_a2"] = jnp.array([prelu_vals[2 * l + 1]], jnp.float32)

    x = jax.random.normal(keys[12], (2, Cin, 16, 16), jnp.float32)   # NCHW

    out = jax.jit(encoder_forward)(x, params)
    out = jax.block_until_ready(out)

    ref = encoder_reference(x, params)
    assert out.shape == (2, C, 16, 16), out.shape
    # bf16 MXU operands (f32 accumulation) -> relaxed tolerance per the review.
    tol = 2e-2 if MXU_DTYPE == jnp.bfloat16 else 1e-4
    err = float(jnp.max(jnp.abs(out - ref)))
    assert jnp.allclose(out, ref, atol=tol, rtol=tol), err

    print("KERNEL_OK")
</pallas_src>

<mosaic_0001>
module attributes {stable_mosaic.version = 11 : i64} {
  func.func @kernel(%arg0: i32, %arg1: memref<1x8x256xf32, #tpu.memory_space<vmem>>, %arg2: memref<6x8x72xbf16, #tpu.memory_space<vmem>>, %arg3: memref<6x8x1xf32, #tpu.memory_space<vmem>>, %arg4: memref<5xf32, #tpu.memory_space<smem>>, %arg5: memref<72x256xf32, #tpu.memory_space<vmem>>, %arg6: memref<1x8x256xf32, #tpu.memory_space<vmem>>, %arg7: memref<72x256xf32, #tpu.memory_space<vmem>>) attributes {dimension_semantics = [#tpu.dimension_semantics<parallel>], iteration_bounds = array<i64: 2>, scalar_prefetch = 0 : i64, scratch_operands = 1 : i64, tpu.core_type = #tpu.core_type<tc>, window_params = [{transform_indices = @transform_0, window_bounds = array<i64: 1, 8, 256>}, {pipeline_mode = #tpu.pipeline_mode<synchronous>, transform_indices = @transform_1, window_bounds = array<i64: 6, 8, 72>}, {pipeline_mode = #tpu.pipeline_mode<synchronous>, transform_indices = @transform_2, window_bounds = array<i64: 6, 8, 1>}, {transform_indices = @transform_3, window_bounds = array<i64: 5>}, {pipeline_mode = #tpu.pipeline_mode<synchronous>, transform_indices = @transform_4, window_bounds = array<i64: 72, 256>}, {transform_indices = @transform_5, window_bounds = array<i64: 1, 8, 256>}]} {
    %c0 = arith.constant 0 : index
    %c0_0 = arith.constant 0 : index
    %c0_1 = arith.constant 0 : index
    %0 = vector.load %arg1[%c0, %c0_0, %c0_1] : memref<1x8x256xf32, #tpu.memory_space<vmem>>, vector<1x8x256xf32>
    %1 = vector.shape_cast %0 : vector<1x8x256xf32> to vector<8x256xf32>
    %c0_2 = arith.constant 0 : index
    %c0_3 = arith.constant 0 : index
    %c0_4 = arith.constant 0 : index
    %2 = vector.load %arg2[%c0_2, %c0_3, %c0_4] : memref<6x8x72xbf16, #tpu.memory_space<vmem>>, vector<1x8x72xbf16>
    %3 = vector.shape_cast %2 : vector<1x8x72xbf16> to vector<8x72xbf16>
    %c0_5 = arith.constant 0 : index
    %c0_6 = arith.constant 0 : index
    %c0_7 = arith.constant 0 : index
    %4 = vector.load %arg3[%c0_5, %c0_6, %c0_7] : memref<6x8x1xf32, #tpu.memory_space<vmem>>, vector<1x8x1xf32>
    %5 = vector.shape_cast %4 : vector<1x8x1xf32> to vector<8x1xf32>
    %c17_i32 = arith.constant 17 : i32
    %6 = tpu.dynamic_rotate %1 by %c17_i32 dim 1 : vector<8x256xf32>, i32 -> vector<8x256xf32>
    %c0_8 = arith.constant 0 : index
    %c0_9 = arith.constant 0 : index
    %7 = vector.load %arg5[%c0_8, %c0_9] : memref<72x256xf32, #tpu.memory_space<vmem>>, vector<8x256xf32>
    %8 = arith.mulf %6, %7 : vector<8x256xf32>
    %c0_10 = arith.constant 0 : index
    %c0_11 = arith.constant 0 : index
    %9 = vector.load %arg7[%c0_10, %c0_11] : memref<72x256xf32, #tpu.memory_space<vmem>>, vector<8x256xf32>
    tpu.vector_store %arg7[%c0_10, %c0_11], %8 {strides = array<i32>} : memref<72x256xf32, #tpu.memory_space<vmem>>, vector<8x256xf32>,
    %c16_i32 = arith.constant 16 : i32
    %10 = tpu.dynamic_rotate %1 by %c16_i32 dim 1 : vector<8x256xf32>, i32 -> vector<8x256xf32>
    %c8 = arith.constant 8 : index
    %c0_12 = arith.constant 0 : index
    %11 = vector.load %arg5[%c8, %c0_12] : memref<72x256xf32, #tpu.memory_space<vmem>>, vector<8x256xf32>
    %12 = arith.mulf %10, %11 : vector<8x256xf32>
    %c8_13 = arith.constant 8 : index
    %c0_14 = arith.constant 0 : index
    %13 = vector.load %arg7[%c8_13, %c0_14] : memref<72x256xf32, #tpu.memory_space<vmem>>, vector<8x256xf32>
    tpu.vector_store %arg7[%c8_13, %c0_14], %12 {strides = array<i32>} : memref<72x256xf32, #tpu.memory_space<vmem>>, vector<8x256xf32>,
    %c15_i32 = arith.constant 15 : i32
    %14 = tpu.dynamic_rotate %1 by %c15_i32 dim 1 : vector<8x256xf32>, i32 -> vector<8x256xf32>
    %c16 = arith.constant 16 : index
    %c0_15 = arith.constant 0 : index
    %15 = vector.load %arg5[%c16, %c0_15] : memref<72x256xf32, #tpu.memory_space<vmem>>, vector<8x256xf32>
    %16 = arith.mulf %14, %15 : vector<8x256xf32>
    %c16_16 = arith.constant 16 : index
    %c0_17 = arith.constant 0 : index
    %17 = vector.load %arg7[%c16_16, %c0_17] : memref<72x256xf32, #tpu.memory_space<vmem>>, vector<8x256xf32>
    tpu.vector_store %arg7[%c16_16, %c0_17], %16 {strides = array<i32>} : memref<72x256xf32, #tpu.memory_space<vmem>>, vector<8x256xf32>,
    %c1_i32 = arith.constant 1 : i32
    %18 = tpu.dynamic_rotate %1 by %c1_i32 dim 1 : vector<8x256xf32>, i32 -> vector<8x256xf32>
    %c24 = arith.constant 24 : index
    %c0_18 = arith.constant 0 : index
    %19 = vector.load %arg5[%c24, %c0_18] : memref<72x256xf32, #tpu.memory_space<vmem>>, vector<8x256xf32>
    %20 = arith.mulf %18, %19 : vector<8x256xf32>
    %c24_19 = arith.constant 24 : index
    %c0_20 = arith.constant 0 : index
    %21 = vector.load %arg7[%c24_19, %c0_20] : memref<72x256xf32, #tpu.memory_space<vmem>>, vector<8x256xf32>
    tpu.vector_store %arg7[%c24_19, %c0_20], %20 {strides = array<i32>} : memref<72x256xf32, #tpu.memory_space<vmem>>, vector<8x256xf32>,
    %c32 = arith.constant 32 : index
    %c0_21 = arith.constant 0 : index
    %22 = vector.load %arg7[%c32, %c0_21] : memref<72x256xf32, #tpu.memory_space<vmem>>, vector<8x256xf32>
    tpu.vector_store %arg7[%c32, %c0_21], %1 {strides = array<i32>} : memref<72x256xf32, #tpu.memory_space<vmem>>, vector<8x256xf32>,
    %c255_i32 = arith.constant 255 : i32
    %23 = tpu.dynamic_rotate %1 by %c255_i32 dim 1 : vector<8x256xf32>, i32 -> vector<8x256xf32>
    %c40 = arith.constant 40 : index
    %c0_22 = arith.constant 0 : index
    %24 = vector.load %arg5[%c40, %c0_22] : memref<72x256xf32, #tpu.memory_space<vmem>>, vector<8x256xf32>
    %25 = arith.mulf %23, %24 : vector<8x256xf32>
    %c40_23 = arith.constant 40 : index
    %c0_24 = arith.constant 0 : index
    %26 = vector.load %arg7[%c40_23, %c0_24] : memref<72x256xf32, #tpu.memory_space<vmem>>, vector<8x256xf32>
    tpu.vector_store %arg7[%c40_23, %c0_24], %25 {strides = array<i32>} : memref<72x256xf32, #tpu.memory_space<vmem>>, vector<8x256xf32>,
    %c241_i32 = arith.constant 241 : i32
    %27 = tpu.dynamic_rotate %1 by %c241_i32 dim 1 : vector<8x256xf32>, i32 -> vector<8x256xf32>
    %c48 = arith.constant 48 : index
    %c0_25 = arith.constant 0 : index
    %28 = vector.load %arg5[%c48, %c0_25] : memref<72x256xf32, #tpu.memory_space<vmem>>, vector<8x256xf32>
    %29 = arith.mulf %27, %28 : vector<8x256xf32>
    %c48_26 = arith.constant 48 : index
    %c0_27 = arith.constant 0 : index
    %30 = vector.load %arg7[%c48_26, %c0_27] : memref<72x256xf32, #tpu.memory_space<vmem>>, vector<8x256xf32>
    tpu.vector_store %arg7[%c48_26, %c0_27], %29 {strides = array<i32>} : memref<72x256xf32, #tpu.memory_space<vmem>>, vector<8x256xf32>,
    %c240_i32 = arith.constant 240 : i32
    %31 = tpu.dynamic_rotate %1 by %c240_i32 dim 1 : vector<8x256xf32>, i32 -> vector<8x256xf32>
    %c56 = arith.constant 56 : index
    %c0_28 = arith.constant 0 : index
    %32 = vector.load %arg5[%c56, %c0_28] : memref<72x256xf32, #tpu.memory_space<vmem>>, vector<8x256xf32>
    %33 = arith.mulf %31, %32 : vector<8x256xf32>
    %c56_29 = arith.constant 56 : index
    %c0_30 = arith.constant 0 : index
    %34 = vector.load %arg7[%c56_29, %c0_30] : memref<72x256xf32, #tpu.memory_space<vmem>>, vector<8x256xf32>
    tpu.vector_store %arg7[%c56_29, %c0_30], %33 {strides = array<i32>} : memref<72x256xf32, #tpu.memory_space<vmem>>, vector<8x256xf32>,
    %c239_i32 = arith.constant 239 : i32
    %35 = tpu.dynamic_rotate %1 by %c239_i32 dim 1 : vector<8x256xf32>, i32 -> vector<8x256xf32>
    %c64 = arith.constant 64 : index
    %c0_31 = arith.constant 0 : index
    %36 = vector.load %arg5[%c64, %c0_31] : memref<72x256xf32, #tpu.memory_space<vmem>>, vector<8x256xf32>
    %37 = arith.mulf %35, %36 : vector<8x256xf32>
    %c64_32 = arith.constant 64 : index
    %c0_33 = arith.constant 0 : index
    %38 = vector.load %arg7[%c64_32, %c0_33] : memref<72x256xf32, #tpu.memory_space<vmem>>, vector<8x256xf32>
    tpu.vector_store %arg7[%c64_32, %c0_33], %37 {strides = array<i32>} : memref<72x256xf32, #tpu.memory_space<vmem>>, vector<8x256xf32>,
    %c0_34 = arith.constant 0 : index
    %c0_35 = arith.constant 0 : index
    %39 = vector.load %arg7[%c0_34, %c0_35] : memref<72x256xf32, #tpu.memory_space<vmem>>, vector<72x256xf32>
    %40 = arith.truncf %39 : vector<72x256xf32> to vector<72x256xbf16>
    %cst = arith.constant dense<0.000000e+00> : vector<8x256xf32>
    %41 = tpu.matmul %3, %40, %cst {dimension_numbers = #tpu.dot_dimension_numbers<[1], [0], [0], [1], [0, 0, 1, 1], [], []>} : vector<8x72xbf16>, vector<72x256xbf16>, vector<8x256xf32> -> vector<8x256xf32>
    %42 = vector.broadcast %5 : vector<8x1xf32> to vector<8x256xf32>
    %43 = arith.addf %41, %42 : vector<8x256xf32>
    %c0_36 = arith.constant 0 : index
    %44 = memref.load %arg4[%c0_36] : memref<5xf32, #tpu.memory_space<smem>>
    %cst_37 = arith.constant 0.000000e+00 : f32
    %45 = vector.broadcast %cst_37 : f32 to vector<8x256xf32>
    %46 = arith.cmpf oge, %43, %45 : vector<8x256xf32>
    %47 = vector.broadcast %44 : f32 to vector<8x256xf32>
    %48 = arith.mulf %47, %43 : vector<8x256xf32>
    %49 = arith.select %46, %43, %48 : vector<8x256xi1>, vector<8x256xf32>
    %c1 = arith.constant 1 : index
    %c0_38 = arith.constant 0 : index
    %c0_39 = arith.constant 0 : index
    %50 = vector.load %arg2[%c1, %c0_38, %c0_39] : memref<6x8x72xbf16, #tpu.memory_space<vmem>>, vector<1x8x72xbf16>
    %51 = vector.shape_cast %50 : vector<1x8x72xbf16> to vector<8x72xbf16>
    %c1_40 = arith.constant 1 : index
    %c0_41 = arith.constant 0 : index
    %c0_42 = arith.constant 0 : index
    %52 = vector.load %arg3[%c1_40, %c0_41, %c0_42] : memref<6x8x1xf32, #tpu.memory_space<vmem>>, vector<1x8x1xf32>
    %53 = vector.shape_cast %52 : vector<1x8x1xf32> to vector<8x1xf32>
    %c17_i32_43 = arith.constant 17 : i32
    %54 = tpu.dynamic_rotate %49 by %c17_i32_43 dim 1 : vector<8x256xf32>, i32 -> vector<8x256xf32>
    %c0_44 = arith.constant 0 : index
    %c0_45 = arith.constant 0 : index
    %55 = vector.load %arg5[%c0_44, %c0_45] : memref<72x256xf32, #tpu.memory_space<vmem>>, vector<8x256xf32>
    %56 = arith.mulf %54, %55 : vector<8x256xf32>
    %c0_46 = arith.constant 0 : index
    %c0_47 = arith.constant 0 : index
    %57 = vector.load %arg7[%c0_46, %c0_47] : memref<72x256xf32, #tpu.memory_space<vmem>>, vector<8x256xf32>
    tpu.vector_store %arg7[%c0_46, %c0_47], %56 {strides = array<i32>} : memref<72x256xf32, #tpu.memory_space<vmem>>, vector<8x256xf32>,
    %c16_i32_48 = arith.constant 16 : i32
    %58 = tpu.dynamic_rotate %49 by %c16_i32_48 dim 1 : vector<8x256xf32>, i32 -> vector<8x256xf32>
    %c8_49 = arith.constant 8 : index
    %c0_50 = arith.constant 0 : index
    %59 = vector.load %arg5[%c8_49, %c0_50] : memref<72x256xf32, #tpu.memory_space<vmem>>, vector<8x256xf32>
    %60 = arith.mulf %58, %59 : vector<8x256xf32>
    %c8_51 = arith.constant 8 : index
    %c0_52 = arith.constant 0 : index
    %61 = vector.load %arg7[%c8_51, %c0_52] : memref<72x256xf32, #tpu.memory_space<vmem>>, vector<8x256xf32>
    tpu.vector_store %arg7[%c8_51, %c0_52], %60 {strides = array<i32>} : memref<72x256xf32, #tpu.memory_space<vmem>>, vector<8x256xf32>,
    %c15_i32_53 = arith.constant 15 : i32
    %62 = tpu.dynamic_rotate %49 by %c15_i32_53 dim 1 : vector<8x256xf32>, i32 -> vector<8x256xf32>
    %c16_54 = arith.constant 16 : index
    %c0_55 = arith.constant 0 : index
    %63 = vector.load %arg5[%c16_54, %c0_55] : memref<72x256xf32, #tpu.memory_space<vmem>>, vector<8x256xf32>
    %64 = arith.mulf %62, %63 : vector<8x256xf32>
    %c16_56 = arith.constant 16 : index
    %c0_57 = arith.constant 0 : index
    %65 = vector.load %arg7[%c16_56, %c0_57] : memref<72x256xf32, #tpu.memory_space<vmem>>, vector<8x256xf32>
    tpu.vector_store %arg7[%c16_56, %c0_57], %64 {strides = array<i32>} : memref<72x256xf32, #tpu.memory_space<vmem>>, vector<8x256xf32>,
    %c1_i32_58 = arith.constant 1 : i32
    %66 = tpu.dynamic_rotate %49 by %c1_i32_58 dim 1 : vector<8x256xf32>, i32 -> vector<8x256xf32>
    %c24_59 = arith.constant 24 : index
    %c0_60 = arith.constant 0 : index
    %67 = vector.load %arg5[%c24_59, %c0_60] : memref<72x256xf32, #tpu.memory_space<vmem>>, vector<8x256xf32>
    %68 = arith.mulf %66, %67 : vector<8x256xf32>
    %c24_61 = arith.constant 24 : index
    %c0_62 = arith.constant 0 : index
    %69 = vector.load %arg7[%c24_61, %c0_62] : memref<72x256xf32, #tpu.memory_space<vmem>>, vector<8x256xf32>
    tpu.vector_store %arg7[%c24_61, %c0_62], %68 {strides = array<i32>} : memref<72x256xf32, #tpu.memory_space<vmem>>, vector<8x256xf32>,
    %c32_63 = arith.constant 32 : index
    %c0_64 = arith.constant 0 : index
    %70 = vector.load %arg7[%c32_63, %c0_64] : memref<72x256xf32, #tpu.memory_space<vmem>>, vector<8x256xf32>
    tpu.vector_store %arg7[%c32_63, %c0_64], %49 {strides = array<i32>} : memref<72x256xf32, #tpu.memory_space<vmem>>, vector<8x256xf32>,
    %c255_i32_65 = arith.constant 255 : i32
    %71 = tpu.dynamic_rotate %49 by %c255_i32_65 dim 1 : vector<8x256xf32>, i32 -> vector<8x256xf32>
    %c40_66 = arith.constant 40 : index
    %c0_67 = arith.constant 0 : index
    %72 = vector.load %arg5[%c40_66, %c0_67] : memref<72x256xf32, #tpu.memory_space<vmem>>, vector<8x256xf32>
    %73 = arith.mulf %71, %72 : vector<8x256xf32>
    %c40_68 = arith.constant 40 : index
    %c0_69 = arith.constant 0 : index
    %74 = vector.load %arg7[%c40_68, %c0_69] : memref<72x256xf32, #tpu.memory_space<vmem>>, vector<8x256xf32>
    tpu.vector_store %arg7[%c40_68, %c0_69], %73 {strides = array<i32>} : memref<72x256xf32, #tpu.memory_space<vmem>>, vector<8x256xf32>,
    %c241_i32_70 = arith.constant 241 : i32
    %75 = tpu.dynamic_rotate %49 by %c241_i32_70 dim 1 : vector<8x256xf32>, i32 -> vector<8x256xf32>
    %c48_71 = arith.constant 48 : index
    %c0_72 = arith.constant 0 : index
    %76 = vector.load %arg5[%c48_71, %c0_72] : memref<72x256xf32, #tpu.memory_space<vmem>>, vector<8x256xf32>
    %77 = arith.mulf %75, %76 : vector<8x256xf32>
    %c48_73 = arith.constant 48 : index
    %c0_74 = arith.constant 0 : index
    %78 = vector.load %arg7[%c48_73, %c0_74] : memref<72x256xf32, #tpu.memory_space<vmem>>, vector<8x256xf32>
    tpu.vector_store %arg7[%c48_73, %c0_74], %77 {strides = array<i32>} : memref<72x256xf32, #tpu.memory_space<vmem>>, vector<8x256xf32>,
    %c240_i32_75 = arith.constant 240 : i32
    %79 = tpu.dynamic_rotate %49 by %c240_i32_75 dim 1 : vector<8x256xf32>, i32 -> vector<8x256xf32>
    %c56_76 = arith.constant 56 : index
    %c0_77 = arith.constant 0 : index
    %80 = vector.load %arg5[%c56_76, %c0_77] : memref<72x256xf32, #tpu.memory_space<vmem>>, vector<8x256xf32>
    %81 = arith.mulf %79, %80 : vector<8x256xf32>
    %c56_78 = arith.constant 56 : index
    %c0_79 = arith.constant 0 : index
    %82 = vector.load %arg7[%c56_78, %c0_79] : memref<72x256xf32, #tpu.memory_space<vmem>>, vector<8x256xf32>
    tpu.vector_store %arg7[%c56_78, %c0_79], %81 {strides = array<i32>} : memref<72x256xf32, #tpu.memory_space<vmem>>, vector<8x256xf32>,
    %c239_i32_80 = arith.constant 239 : i32
    %83 = tpu.dynamic_rotate %49 by %c239_i32_80 dim 1 : vector<8x256xf32>, i32 -> vector<8x256xf32>
    %c64_81 = arith.constant 64 : index
    %c0_82 = arith.constant 0 : index
    %84 = vector.load %arg5[%c64_81, %c0_82] : memref<72x256xf32, #tpu.memory_space<vmem>>, vector<8x256xf32>
    %85 = arith.mulf %83, %84 : vector<8x256xf32>
    %c64_83 = arith.constant 64 : index
    %c0_84 = arith.constant 0 : index
    %86 = vector.load %arg7[%c64_83, %c0_84] : memref<72x256xf32, #tpu.memory_space<vmem>>, vector<8x256xf32>
    tpu.vector_store %arg7[%c64_83, %c0_84], %85 {strides = array<i32>} : memref<72x256xf32, #tpu.memory_space<vmem>>, vector<8x256xf32>,
    %c0_85 = arith.constant 0 : index
    %c0_86 = arith.constant 0 : index
    %87 = vector.load %arg7[%c0_85, %c0_86] : memref<72x256xf32, #tpu.memory_space<vmem>>, vector<72x256xf32>
    %88 = arith.truncf %87 : vector<72x256xf32> to vector<72x256xbf16>
    %cst_87 = arith.constant dense<0.000000e+00> : vector<8x256xf32>
    %89 = tpu.matmul %51, %88, %cst_87 {dimension_numbers = #tpu.dot_dimension_numbers<[1], [0], [0], [1], [0, 0, 1, 1], [], []>} : vector<8x72xbf16>, vector<72x256xbf16>, vector<8x256xf32> -> vector<8x256xf32>
    %90 = vector.broadcast %53 : vector<8x1xf32> to vector<8x256xf32>
    %91 = arith.addf %89, %90 : vector<8x256xf32>
    %c1_88 = arith.constant 1 : index
    %92 = memref.load %arg4[%c1_88] : memref<5xf32, #tpu.memory_space<smem>>
    %cst_89 = arith.constant 0.000000e+00 : f32
    %93 = vector.broadcast %cst_89 : f32 to vector<8x256xf32>
    %94 = arith.cmpf oge, %91, %93 : vector<8x256xf32>
    %95 = vector.broadcast %92 : f32 to vector<8x256xf32>
    %96 = arith.mulf %95, %91 : vector<8x256xf32>
    %97 = arith.select %94, %91, %96 : vector<8x256xi1>, vector<8x256xf32>
    %c2 = arith.constant 2 : index
    %c0_90 = arith.constant 0 : index
    %c0_91 = arith.constant 0 : index
    %98 = vector.load %arg2[%c2, %c0_90, %c0_91] : memref<6x8x72xbf16, #tpu.memory_space<vmem>>, vector<1x8x72xbf16>
    %99 = vector.shape_cast %98 : vector<1x8x72xbf16> to vector<8x72xbf16>
    %c2_92 = arith.constant 2 : index
    %c0_93 = arith.constant 0 : index
    %c0_94 = arith.constant 0 : index
    %100 = vector.load %arg3[%c2_92, %c0_93, %c0_94] : memref<6x8x1xf32, #tpu.memory_space<vmem>>, vector<1x8x1xf32>
    %101 = vector.shape_cast %100 : vector<1x8x1xf32> to vector<8x1xf32>
    %c17_i32_95 = arith.constant 17 : i32
    %102 = tpu.dynamic_rotate %97 by %c17_i32_95 dim 1 : vector<8x256xf32>, i32 -> vector<8x256xf32>
    %c0_96 = arith.constant 0 : index
    %c0_97 = arith.constant 0 : index
    %103 = vector.load %arg5[%c0_96, %c0_97] : memref<72x256xf32, #tpu.memory_space<vmem>>, vector<8x256xf32>
    %104 = arith.mulf %102, %103 : vector<8x256xf32>
    %c0_98 = arith.constant 0 : index
    %c0_99 = arith.constant 0 : index
    %105 = vector.load %arg7[%c0_98, %c0_99] : memref<72x256xf32, #tpu.memory_space<vmem>>, vector<8x256xf32>
    tpu.vector_store %arg7[%c0_98, %c0_99], %104 {strides = array<i32>} : memref<72x256xf32, #tpu.memory_space<vmem>>, vector<8x256xf32>,
    %c16_i32_100 = arith.constant 16 : i32
    %106 = tpu.dynamic_rotate %97 by %c16_i32_100 dim 1 : vector<8x256xf32>, i32 -> vector<8x256xf32>
    %c8_101 = arith.constant 8 : index
    %c0_102 = arith.constant 0 : index
    %107 = vector.load %arg5[%c8_101, %c0_102] : memref<72x256xf32, #tpu.memory_space<vmem>>, vector<8x256xf32>
    %108 = arith.mulf %106, %107 : vector<8x256xf32>
    %c8_103 = arith.constant 8 : index
    %c0_104 = arith.constant 0 : index
    %109 = vector.load %arg7[%c8_103, %c0_104] : memref<72x256xf32, #tpu.memory_space<vmem>>, vector<8x256xf32>
    tpu.vector_store %arg7[%c8_103, %c0_104], %108 {strides = array<i32>} : memref<72x256xf32, #tpu.memory_space<vmem>>, vector<8x256xf32>,
    %c15_i32_105 = arith.constant 15 : i32
    %110 = tpu.dynamic_rotate %97 by %c15_i32_105 dim 1 : vector<8x256xf32>, i32 -> vector<8x256xf32>
    %c16_106 = arith.constant 16 : index
    %c0_107 = arith.constant 0 : index
    %111 = vector.load %arg5[%c16_106, %c0_107] : memref<72x256xf32, #tpu.memory_space<vmem>>, vector<8x256xf32>
    %112 = arith.mulf %110, %111 : vector<8x256xf32>
    %c16_108 = arith.constant 16 : index
    %c0_109 = arith.constant 0 : index
    %113 = vector.load %arg7[%c16_108, %c0_109] : memref<72x256xf32, #tpu.memory_space<vmem>>, vector<8x256xf32>
    tpu.vector_store %arg7[%c16_108, %c0_109], %112 {strides = array<i32>} : memref<72x256xf32, #tpu.memory_space<vmem>>, vector<8x256xf32>,
    %c1_i32_110 = arith.constant 1 : i32
    %114 = tpu.dynamic_rotate %97 by %c1_i32_110 dim 1 : vector<8x256xf32>, i32 -> vector<8x256xf32>
    %c24_111 = arith.constant 24 : index
    %c0_112 = arith.constant 0 : index
    %115 = vector.load %arg5[%c24_111, %c0_112] : memref<72x256xf32, #tpu.memory_space<vmem>>, vector<8x256xf32>
    %116 = arith.mulf %114, %115 : vector<8x256xf32>
    %c24_113 = arith.constant 24 : index
    %c0_114 = arith.constant 0 : index
    %117 = vector.load %arg7[%c24_113, %c0_114] : memref<72x256xf32, #tpu.memory_space<vmem>>, vector<8x256xf32>
    tpu.vector_store %arg7[%c24_113, %c0_114], %116 {strides = array<i32>} : memref<72x256xf32, #tpu.memory_space<vmem>>, vector<8x256xf32>,
    %c32_115 = arith.constant 32 : index
    %c0_116 = arith.constant 0 : index
    %118 = vector.load %arg7[%c32_115, %c0_116] : memref<72x256xf32, #tpu.memory_space<vmem>>, vector<8x256xf32>
    tpu.vector_store %arg7[%c32_115, %c0_116], %97 {strides = array<i32>} : memref<72x256xf32, #tpu.memory_space<vmem>>, vector<8x256xf32>,
    %c255_i32_117 = arith.constant 255 : i32
    %119 = tpu.dynamic_rotate %97 by %c255_i32_117 dim 1 : vector<8x256xf32>, i32 -> vector<8x256xf32>
    %c40_118 = arith.constant 40 : index
    %c0_119 = arith.constant 0 : index
    %120 = vector.load %arg5[%c40_118, %c0_119] : memref<72x256xf32, #tpu.memory_space<vmem>>, vector<8x256xf32>
    %121 = arith.mulf %119, %120 : vector<8x256xf32>
    %c40_120 = arith.constant 40 : index
    %c0_121 = arith.constant 0 : index
    %122 = vector.load %arg7[%c40_120, %c0_121] : memref<72x256xf32, #tpu.memory_space<vmem>>, vector<8x256xf32>
    tpu.vector_store %arg7[%c40_120, %c0_121], %121 {strides = array<i32>} : memref<72x256xf32, #tpu.memory_space<vmem>>, vector<8x256xf32>,
    %c241_i32_122 = arith.constant 241 : i32
    %123 = tpu.dynamic_rotate %97 by %c241_i32_122 dim 1 : vector<8x256xf32>, i32 -> vector<8x256xf32>
    %c48_123 = arith.constant 48 : index
    %c0_124 = arith.constant 0 : index
    %124 = vector.load %arg5[%c48_123, %c0_124] : memref<72x256xf32, #tpu.memory_space<vmem>>, vector<8x256xf32>
    %125 = arith.mulf %123, %124 : vector<8x256xf32>
    %c48_125 = arith.constant 48 : index
    %c0_126 = arith.constant 0 : index
    %126 = vector.load %arg7[%c48_125, %c0_126] : memref<72x256xf32, #tpu.memory_space<vmem>>, vector<8x256xf32>
    tpu.vector_store %arg7[%c48_125, %c0_126], %125 {strides = array<i32>} : memref<72x256xf32, #tpu.memory_space<vmem>>, vector<8x256xf32>,
    %c240_i32_127 = arith.constant 240 : i32
    %127 = tpu.dynamic_rotate %97 by %c240_i32_127 dim 1 : vector<8x256xf32>, i32 -> vector<8x256xf32>
    %c56_128 = arith.constant 56 : index
    %c0_129 = arith.constant 0 : index
    %128 = vector.load %arg5[%c56_128, %c0_129] : memref<72x256xf32, #tpu.memory_space<vmem>>, vector<8x256xf32>
    %129 = arith.mulf %127, %128 : vector<8x256xf32>
    %c56_130 = arith.constant 56 : index
    %c0_131 = arith.constant 0 : index
    %130 = vector.load %arg7[%c56_130, %c0_131] : memref<72x256xf32, #tpu.memory_space<vmem>>, vector<8x256xf32>
    tpu.vector_store %arg7[%c56_130, %c0_131], %129 {strides = array<i32>} : memref<72x256xf32, #tpu.memory_space<vmem>>, vector<8x256xf32>,
    %c239_i32_132 = arith.constant 239 : i32
    %131 = tpu.dynamic_rotate %97 by %c239_i32_132 dim 1 : vector<8x256xf32>, i32 -> vector<8x256xf32>
    %c64_133 = arith.constant 64 : index
    %c0_134 = arith.constant 0 : index
    %132 = vector.load %arg5[%c64_133, %c0_134] : memref<72x256xf32, #tpu.memory_space<vmem>>, vector<8x256xf32>
    %133 = arith.mulf %131, %132 : vector<8x256xf32>
    %c64_135 = arith.constant 64 : index
    %c0_136 = arith.constant 0 : index
    %134 = vector.load %arg7[%c64_135, %c0_136] : memref<72x256xf32, #tpu.memory_space<vmem>>, vector<8x256xf32>
    tpu.vector_store %arg7[%c64_135, %c0_136], %133 {strides = array<i32>} : memref<72x256xf32, #tpu.memory_space<vmem>>, vector<8x256xf32>,
    %c0_137 = arith.constant 0 : index
    %c0_138 = arith.constant 0 : index
    %135 = vector.load %arg7[%c0_137, %c0_138] : memref<72x256xf32, #tpu.memory_space<vmem>>, vector<72x256xf32>
    %136 = arith.truncf %135 : vector<72x256xf32> to vector<72x256xbf16>
    %cst_139 = arith.constant dense<0.000000e+00> : vector<8x256xf32>
    %137 = tpu.matmul %99, %136, %cst_139 {dimension_numbers = #tpu.dot_dimension_numbers<[1], [0], [0], [1], [0, 0, 1, 1], [], []>} : vector<8x72xbf16>, vector<72x256xbf16>, vector<8x256xf32> -> vector<8x256xf32>
    %138 = vector.broadcast %101 : vector<8x1xf32> to vector<8x256xf32>
    %139 = arith.addf %137, %138 : vector<8x256xf32>
    %c2_140 = arith.constant 2 : index
    %140 = memref.load %arg4[%c2_140] : memref<5xf32, #tpu.memory_space<smem>>
    %cst_141 = arith.constant 0.000000e+00 : f32
    %141 = vector.broadcast %cst_141 : f32 to vector<8x256xf32>
    %142 = arith.cmpf oge, %139, %141 : vector<8x256xf32>
    %143 = vector.broadcast %140 : f32 to vector<8x256xf32>
    %144 = arith.mulf %143, %139 : vector<8x256xf32>
    %145 = arith.select %142, %139, %144 : vector<8x256xi1>, vector<8x256xf32>
    %146 = arith.addf %49, %145 : vector<8x256xf32>
    %c3 = arith.constant 3 : index
    %c0_142 = arith.constant 0 : index
    %c0_143 = arith.constant 0 : index
    %147 = vector.load %arg2[%c3, %c0_142, %c0_143] : memref<6x8x72xbf16, #tpu.memory_space<vmem>>, vector<1x8x72xbf16>
    %148 = vector.shape_cast %147 : vector<1x8x72xbf16> to vector<8x72xbf16>
    %c3_144 = arith.constant 3 : index
    %c0_145 = arith.constant 0 : index
    %c0_146 = arith.constant 0 : index
    %149 = vector.load %arg3[%c3_144, %c0_145, %c0_146] : memref<6x8x1xf32, #tpu.memory_space<vmem>>, vector<1x8x1xf32>
    %150 = vector.shape_cast %149 : vector<1x8x1xf32> to vector<8x1xf32>
    %c17_i32_147 = arith.constant 17 : i32
    %151 = tpu.dynamic_rotate %146 by %c17_i32_147 dim 1 : vector<8x256xf32>, i32 -> vector<8x256xf32>
    %c0_148 = arith.constant 0 : index
    %c0_149 = arith.constant 0 : index
    %152 = vector.load %arg5[%c0_148, %c0_149] : memref<72x256xf32, #tpu.memory_space<vmem>>, vector<8x256xf32>
    %153 = arith.mulf %151, %152 : vector<8x256xf32>
    %c0_150 = arith.constant 0 : index
    %c0_151 = arith.constant 0 : index
    %154 = vector.load %arg7[%c0_150, %c0_151] : memref<72x256xf32, #tpu.memory_space<vmem>>, vector<8x256xf32>
    tpu.vector_store %arg7[%c0_150, %c0_151], %153 {strides = array<i32>} : memref<72x256xf32, #tpu.memory_space<vmem>>, vector<8x256xf32>,
    %c16_i32_152 = arith.constant 16 : i32
    %155 = tpu.dynamic_rotate %146 by %c16_i32_152 dim 1 : vector<8x256xf32>, i32 -> vector<8x256xf32>
    %c8_153 = arith.constant 8 : index
    %c0_154 = arith.constant 0 : index
    %156 = vector.load %arg5[%c8_153, %c0_154] : memref<72x256xf32, #tpu.memory_space<vmem>>, vector<8x256xf32>
    %157 = arith.mulf %155, %156 : vector<8x256xf32>
    %c8_155 = arith.constant 8 : index
    %c0_156 = arith.constant 0 : index
    %158 = vector.load %arg7[%c8_155, %c0_156] : memref<72x256xf32, #tpu.memory_space<vmem>>, vector<8x256xf32>
    tpu.vector_store %arg7[%c8_155, %c0_156], %157 {strides = array<i32>} : memref<72x256xf32, #tpu.memory_space<vmem>>, vector<8x256xf32>,
    %c15_i32_157 = arith.constant 15 : i32
    %159 = tpu.dynamic_rotate %146 by %c15_i32_157 dim 1 : vector<8x256xf32>, i32 -> vector<8x256xf32>
    %c16_158 = arith.constant 16 : index
    %c0_159 = arith.constant 0 : index
    %160 = vector.load %arg5[%c16_158, %c0_159] : memref<72x256xf32, #tpu.memory_space<vmem>>, vector<8x256xf32>
    %161 = arith.mulf %159, %160 : vector<8x256xf32>
    %c16_160 = arith.constant 16 : index
    %c0_161 = arith.constant 0 : index
    %162 = vector.load %arg7[%c16_160, %c0_161] : memref<72x256xf32, #tpu.memory_space<vmem>>, vector<8x256xf32>
    tpu.vector_store %arg7[%c16_160, %c0_161], %161 {strides = array<i32>} : memref<72x256xf32, #tpu.memory_space<vmem>>, vector<8x256xf32>,
    %c1_i32_162 = arith.constant 1 : i32
    %163 = tpu.dynamic_rotate %146 by %c1_i32_162 dim 1 : vector<8x256xf32>, i32 -> vector<8x256xf32>
    %c24_163 = arith.constant 24 : index
    %c0_164 = arith.constant 0 : index
    %164 = vector.load %arg5[%c24_163, %c0_164] : memref<72x256xf32, #tpu.memory_space<vmem>>, vector<8x256xf32>
    %165 = arith.mulf %163, %164 : vector<8x256xf32>
    %c24_165 = arith.constant 24 : index
    %c0_166 = arith.constant 0 : index
    %166 = vector.load %arg7[%c24_165, %c0_166] : memref<72x256xf32, #tpu.memory_space<vmem>>, vector<8x256xf32>
    tpu.vector_store %arg7[%c24_165, %c0_166], %165 {strides = array<i32>} : memref<72x256xf32, #tpu.memory_space<vmem>>, vector<8x256xf32>,
    %c32_167 = arith.constant 32 : index
    %c0_168 = arith.constant 0 : index
    %167 = vector.load %arg7[%c32_167, %c0_168] : memref<72x256xf32, #tpu.memory_space<vmem>>, vector<8x256xf32>
    tpu.vector_store %arg7[%c32_167, %c0_168], %146 {strides = array<i32>} : memref<72x256xf32, #tpu.memory_space<vmem>>, vector<8x256xf32>,
    %c255_i32_169 = arith.constant 255 : i32
    %168 = tpu.dynamic_rotate %146 by %c255_i32_169 dim 1 : vector<8x256xf32>, i32 -> vector<8x256xf32>
    %c40_170 = arith.constant 40 : index
    %c0_171 = arith.constant 0 : index
    %169 = vector.load %arg5[%c40_170, %c0_171] : memref<72x256xf32, #tpu.memory_space<vmem>>, vector<8x256xf32>
    %170 = arith.mulf %168, %169 : vector<8x256xf32>
    %c40_172 = arith.constant 40 : index
    %c0_173 = arith.constant 0 : index
    %171 = vector.load %arg7[%c40_172, %c0_173] : memref<72x256xf32, #tpu.memory_space<vmem>>, vector<8x256xf32>
    tpu.vector_store %arg7[%c40_172, %c0_173], %170 {strides = array<i32>} : memref<72x256xf32, #tpu.memory_space<vmem>>, vector<8x256xf32>,
    %c241_i32_174 = arith.constant 241 : i32
    %172 = tpu.dynamic_rotate %146 by %c241_i32_174 dim 1 : vector<8x256xf32>, i32 -> vector<8x256xf32>
    %c48_175 = arith.constant 48 : index
    %c0_176 = arith.constant 0 : index
    %173 = vector.load %arg5[%c48_175, %c0_176] : memref<72x256xf32, #tpu.memory_space<vmem>>, vector<8x256xf32>
    %174 = arith.mulf %172, %173 : vector<8x256xf32>
    %c48_177 = arith.constant 48 : index
    %c0_178 = arith.constant 0 : index
    %175 = vector.load %arg7[%c48_177, %c0_178] : memref<72x256xf32, #tpu.memory_space<vmem>>, vector<8x256xf32>
    tpu.vector_store %arg7[%c48_177, %c0_178], %174 {strides = array<i32>} : memref<72x256xf32, #tpu.memory_space<vmem>>, vector<8x256xf32>,
    %c240_i32_179 = arith.constant 240 : i32
    %176 = tpu.dynamic_rotate %146 by %c240_i32_179 dim 1 : vector<8x256xf32>, i32 -> vector<8x256xf32>
    %c56_180 = arith.constant 56 : index
    %c0_181 = arith.constant 0 : index
    %177 = vector.load %arg5[%c56_180, %c0_181] : memref<72x256xf32, #tpu.memory_space<vmem>>, vector<8x256xf32>
    %178 = arith.mulf %176, %177 : vector<8x256xf32>
    %c56_182 = arith.constant 56 : index
    %c0_183 = arith.constant 0 : index
    %179 = vector.load %arg7[%c56_182, %c0_183] : memref<72x256xf32, #tpu.memory_space<vmem>>, vector<8x256xf32>
    tpu.vector_store %arg7[%c56_182, %c0_183], %178 {strides = array<i32>} : memref<72x256xf32, #tpu.memory_space<vmem>>, vector<8x256xf32>,
    %c239_i32_184 = arith.constant 239 : i32
    %180 = tpu.dynamic_rotate %146 by %c239_i32_184 dim 1 : vector<8x256xf32>, i32 -> vector<8x256xf32>
    %c64_185 = arith.constant 64 : index
    %c0_186 = arith.constant 0 : index
    %181 = vector.load %arg5[%c64_185, %c0_186] : memref<72x256xf32, #tpu.memory_space<vmem>>, vector<8x256xf32>
    %182 = arith.mulf %180, %181 : vector<8x256xf32>
    %c64_187 = arith.constant 64 : index
    %c0_188 = arith.constant 0 : index
    %183 = vector.load %arg7[%c64_187, %c0_188] : memref<72x256xf32, #tpu.memory_space<vmem>>, vector<8x256xf32>
    tpu.vector_store %arg7[%c64_187, %c0_188], %182 {strides = array<i32>} : memref<72x256xf32, #tpu.memory_space<vmem>>, vector<8x256xf32>,
    %c0_189 = arith.constant 0 : index
    %c0_190 = arith.constant 0 : index
    %184 = vector.load %arg7[%c0_189, %c0_190] : memref<72x256xf32, #tpu.memory_space<vmem>>, vector<72x256xf32>
    %185 = arith.truncf %184 : vector<72x256xf32> to vector<72x256xbf16>
    %cst_191 = arith.constant dense<0.000000e+00> : vector<8x256xf32>
    %186 = tpu.matmul %148, %185, %cst_191 {dimension_numbers = #tpu.dot_dimension_numbers<[1], [0], [0], [1], [0, 0, 1, 1], [], []>} : vector<8x72xbf16>, vector<72x256xbf16>, vector<8x256xf32> -> vector<8x256xf32>
    %187 = vector.broadcast %150 : vector<8x1xf32> to vector<8x256xf32>
    %188 = arith.addf %186, %187 : vector<8x256xf32>
    %c3_192 = arith.constant 3 : index
    %189 = memref.load %arg4[%c3_192] : memref<5xf32, #tpu.memory_space<smem>>
    %cst_193 = arith.constant 0.000000e+00 : f32
    %190 = vector.broadcast %cst_193 : f32 to vector<8x256xf32>
    %191 = arith.cmpf oge, %188, %190 : vector<8x256xf32>
    %192 = vector.broadcast %189 : f32 to vector<8x256xf32>
    %193 = arith.mulf %192, %188 : vector<8x256xf32>
    %194 = arith.select %191, %188, %193 : vector<8x256xi1>, vector<8x256xf32>
    %c4 = arith.constant 4 : index
    %c0_194 = arith.constant 0 : index
    %c0_195 = arith.constant 0 : index
    %195 = vector.load %arg2[%c4, %c0_194, %c0_195] : memref<6x8x72xbf16, #tpu.memory_space<vmem>>, vector<1x8x72xbf16>
    %196 = vector.shape_cast %195 : vector<1x8x72xbf16> to vector<8x72xbf16>
    %c4_196 = arith.constant 4 : index
    %c0_197 = arith.constant 0 : index
    %c0_198 = arith.constant 0 : index
    %197 = vector.load %arg3[%c4_196, %c0_197, %c0_198] : memref<6x8x1xf32, #tpu.memory_space<vmem>>, vector<1x8x1xf32>
    %198 = vector.shape_cast %197 : vector<1x8x1xf32> to vector<8x1xf32>
    %c17_i32_199 = arith.constant 17 : i32
    %199 = tpu.dynamic_rotate %194 by %c17_i32_199 dim 1 : vector<8x256xf32>, i32 -> vector<8x256xf32>
    %c0_200 = arith.constant 0 : index
    %c0_201 = arith.constant 0 : index
    %200 = vector.load %arg5[%c0_200, %c0_201] : memref<72x256xf32, #tpu.memory_space<vmem>>, vector<8x256xf32>
    %201 = arith.mulf %199, %200 : vector<8x256xf32>
    %c0_202 = arith.constant 0 : index
    %c0_203 = arith.constant 0 : index
    %202 = vector.load %arg7[%c0_202, %c0_203] : memref<72x256xf32, #tpu.memory_space<vmem>>, vector<8x256xf32>
    tpu.vector_store %arg7[%c0_202, %c0_203], %201 {strides = array<i32>} : memref<72x256xf32, #tpu.memory_space<vmem>>, vector<8x256xf32>,
    %c16_i32_204 = arith.constant 16 : i32
    %203 = tpu.dynamic_rotate %194 by %c16_i32_204 dim 1 : vector<8x256xf32>, i32 -> vector<8x256xf32>
    %c8_205 = arith.constant 8 : index
    %c0_206 = arith.constant 0 : index
    %204 = vector.load %arg5[%c8_205, %c0_206] : memref<72x256xf32, #tpu.memory_space<vmem>>, vector<8x256xf32>
    %205 = arith.mulf %203, %204 : vector<8x256xf32>
    %c8_207 = arith.constant 8 : index
    %c0_208 = arith.constant 0 : index
    %206 = vector.load %arg7[%c8_207, %c0_208] : memref<72x256xf32, #tpu.memory_space<vmem>>, vector<8x256xf32>
    tpu.vector_store %arg7[%c8_207, %c0_208], %205 {strides = array<i32>} : memref<72x256xf32, #tpu.memory_space<vmem>>, vector<8x256xf32>,
    %c15_i32_209 = arith.constant 15 : i32
    %207 = tpu.dynamic_rotate %194 by %c15_i32_209 dim 1 : vector<8x256xf32>, i32 -> vector<8x256xf32>
    %c16_210 = arith.constant 16 : index
    %c0_211 = arith.constant 0 : index
    %208 = vector.load %arg5[%c16_210, %c0_211] : memref<72x256xf32, #tpu.memory_space<vmem>>, vector<8x256xf32>
    %209 = arith.mulf %207, %208 : vector<8x256xf32>
    %c16_212 = arith.constant 16 : index
    %c0_213 = arith.constant 0 : index
    %210 = vector.load %arg7[%c16_212, %c0_213] : memref<72x256xf32, #tpu.memory_space<vmem>>, vector<8x256xf32>
    tpu.vector_store %arg7[%c16_212, %c0_213], %209 {strides = array<i32>} : memref<72x256xf32, #tpu.memory_space<vmem>>, vector<8x256xf32>,
    %c1_i32_214 = arith.constant 1 : i32
    %211 = tpu.dynamic_rotate %194 by %c1_i32_214 dim 1 : vector<8x256xf32>, i32 -> vector<8x256xf32>
    %c24_215 = arith.constant 24 : index
    %c0_216 = arith.constant 0 : index
    %212 = vector.load %arg5[%c24_215, %c0_216] : memref<72x256xf32, #tpu.memory_space<vmem>>, vector<8x256xf32>
    %213 = arith.mulf %211, %212 : vector<8x256xf32>
    %c24_217 = arith.constant 24 : index
    %c0_218 = arith.constant 0 : index
    %214 = vector.load %arg7[%c24_217, %c0_218] : memref<72x256xf32, #tpu.memory_space<vmem>>, vector<8x256xf32>
    tpu.vector_store %arg7[%c24_217, %c0_218], %213 {strides = array<i32>} : memref<72x256xf32, #tpu.memory_space<vmem>>, vector<8x256xf32>,
    %c32_219 = arith.constant 32 : index
    %c0_220 = arith.constant 0 : index
    %215 = vector.load %arg7[%c32_219, %c0_220] : memref<72x256xf32, #tpu.memory_space<vmem>>, vector<8x256xf32>
    tpu.vector_store %arg7[%c32_219, %c0_220], %194 {strides = array<i32>} : memref<72x256xf32, #tpu.memory_space<vmem>>, vector<8x256xf32>,
    %c255_i32_221 = arith.constant 255 : i32
    %216 = tpu.dynamic_rotate %194 by %c255_i32_221 dim 1 : vector<8x256xf32>, i32 -> vector<8x256xf32>
    %c40_222 = arith.constant 40 : index
    %c0_223 = arith.constant 0 : index
    %217 = vector.load %arg5[%c40_222, %c0_223] : memref<72x256xf32, #tpu.memory_space<vmem>>, vector<8x256xf32>
    %218 = arith.mulf %216, %217 : vector<8x256xf32>
    %c40_224 = arith.constant 40 : index
    %c0_225 = arith.constant 0 : index
    %219 = vector.load %arg7[%c40_224, %c0_225] : memref<72x256xf32, #tpu.memory_space<vmem>>, vector<8x256xf32>
    tpu.vector_store %arg7[%c40_224, %c0_225], %218 {strides = array<i32>} : memref<72x256xf32, #tpu.memory_space<vmem>>, vector<8x256xf32>,
    %c241_i32_226 = arith.constant 241 : i32
    %220 = tpu.dynamic_rotate %194 by %c241_i32_226 dim 1 : vector<8x256xf32>, i32 -> vector<8x256xf32>
    %c48_227 = arith.constant 48 : index
    %c0_228 = arith.constant 0 : index
    %221 = vector.load %arg5[%c48_227, %c0_228] : memref<72x256xf32, #tpu.memory_space<vmem>>, vector<8x256xf32>
    %222 = arith.mulf %220, %221 : vector<8x256xf32>
    %c48_229 = arith.constant 48 : index
    %c0_230 = arith.constant 0 : index
    %223 = vector.load %arg7[%c48_229, %c0_230] : memref<72x256xf32, #tpu.memory_space<vmem>>, vector<8x256xf32>
    tpu.vector_store %arg7[%c48_229, %c0_230], %222 {strides = array<i32>} : memref<72x256xf32, #tpu.memory_space<vmem>>, vector<8x256xf32>,
    %c240_i32_231 = arith.constant 240 : i32
    %224 = tpu.dynamic_rotate %194 by %c240_i32_231 dim 1 : vector<8x256xf32>, i32 -> vector<8x256xf32>
    %c56_232 = arith.constant 56 : index
    %c0_233 = arith.constant 0 : index
    %225 = vector.load %arg5[%c56_232, %c0_233] : memref<72x256xf32, #tpu.memory_space<vmem>>, vector<8x256xf32>
    %226 = arith.mulf %224, %225 : vector<8x256xf32>
    %c56_234 = arith.constant 56 : index
    %c0_235 = arith.constant 0 : index
    %227 = vector.load %arg7[%c56_234, %c0_235] : memref<72x256xf32, #tpu.memory_space<vmem>>, vector<8x256xf32>
    tpu.vector_store %arg7[%c56_234, %c0_235], %226 {strides = array<i32>} : memref<72x256xf32, #tpu.memory_space<vmem>>, vector<8x256xf32>,
    %c239_i32_236 = arith.constant 239 : i32
    %228 = tpu.dynamic_rotate %194 by %c239_i32_236 dim 1 : vector<8x256xf32>, i32 -> vector<8x256xf32>
    %c64_237 = arith.constant 64 : index
    %c0_238 = arith.constant 0 : index
    %229 = vector.load %arg5[%c64_237, %c0_238] : memref<72x256xf32, #tpu.memory_space<vmem>>, vector<8x256xf32>
    %230 = arith.mulf %228, %229 : vector<8x256xf32>
    %c64_239 = arith.constant 64 : index
    %c0_240 = arith.constant 0 : index
    %231 = vector.load %arg7[%c64_239, %c0_240] : memref<72x256xf32, #tpu.memory_space<vmem>>, vector<8x256xf32>
    tpu.vector_store %arg7[%c64_239, %c0_240], %230 {strides = array<i32>} : memref<72x256xf32, #tpu.memory_space<vmem>>, vector<8x256xf32>,
    %c0_241 = arith.constant 0 : index
    %c0_242 = arith.constant 0 : index
    %232 = vector.load %arg7[%c0_241, %c0_242] : memref<72x256xf32, #tpu.memory_space<vmem>>, vector<72x256xf32>
    %233 = arith.truncf %232 : vector<72x256xf32> to vector<72x256xbf16>
    %cst_243 = arith.constant dense<0.000000e+00> : vector<8x256xf32>
    %234 = tpu.matmul %196, %233, %cst_243 {dimension_numbers = #tpu.dot_dimension_numbers<[1], [0], [0], [1], [0, 0, 1, 1], [], []>} : vector<8x72xbf16>, vector<72x256xbf16>, vector<8x256xf32> -> vector<8x256xf32>
    %235 = vector.broadcast %198 : vector<8x1xf32> to vector<8x256xf32>
    %236 = arith.addf %234, %235 : vector<8x256xf32>
    %c4_244 = arith.constant 4 : index
    %237 = memref.load %arg4[%c4_244] : memref<5xf32, #tpu.memory_space<smem>>
    %cst_245 = arith.constant 0.000000e+00 : f32
    %238 = vector.broadcast %cst_245 : f32 to vector<8x256xf32>
    %239 = arith.cmpf oge, %236, %238 : vector<8x256xf32>
    %240 = vector.broadcast %237 : f32 to vector<8x256xf32>
    %241 = arith.mulf %240, %236 : vector<8x256xf32>
    %242 = arith.select %239, %236, %241 : vector<8x256xi1>, vector<8x256xf32>
    %243 = arith.addf %146, %242 : vector<8x256xf32>
    %c5 = arith.constant 5 : index
    %c0_246 = arith.constant 0 : index
    %c0_247 = arith.constant 0 : index
    %244 = vector.load %arg2[%c5, %c0_246, %c0_247] : memref<6x8x72xbf16, #tpu.memory_space<vmem>>, vector<1x8x72xbf16>
    %245 = vector.shape_cast %244 : vector<1x8x72xbf16> to vector<8x72xbf16>
    %c5_248 = arith.constant 5 : index
    %c0_249 = arith.constant 0 : index
    %c0_250 = arith.constant 0 : index
    %246 = vector.load %arg3[%c5_248, %c0_249, %c0_250] : memref<6x8x1xf32, #tpu.memory_space<vmem>>, vector<1x8x1xf32>
    %247 = vector.shape_cast %246 : vector<1x8x1xf32> to vector<8x1xf32>
    %c17_i32_251 = arith.constant 17 : i32
    %248 = tpu.dynamic_rotate %243 by %c17_i32_251 dim 1 : vector<8x256xf32>, i32 -> vector<8x256xf32>
    %c0_252 = arith.constant 0 : index
    %c0_253 = arith.constant 0 : index
    %249 = vector.load %arg5[%c0_252, %c0_253] : memref<72x256xf32, #tpu.memory_space<vmem>>, vector<8x256xf32>
    %250 = arith.mulf %248, %249 : vector<8x256xf32>
    %c0_254 = arith.constant 0 : index
    %c0_255 = arith.constant 0 : index
    %251 = vector.load %arg7[%c0_254, %c0_255] : memref<72x256xf32, #tpu.memory_space<vmem>>, vector<8x256xf32>
    tpu.vector_store %arg7[%c0_254, %c0_255], %250 {strides = array<i32>} : memref<72x256xf32, #tpu.memory_space<vmem>>, vector<8x256xf32>,
    %c16_i32_256 = arith.constant 16 : i32
    %252 = tpu.dynamic_rotate %243 by %c16_i32_256 dim 1 : vector<8x256xf32>, i32 -> vector<8x256xf32>
    %c8_257 = arith.constant 8 : index
    %c0_258 = arith.constant 0 : index
    %253 = vector.load %arg5[%c8_257, %c0_258] : memref<72x256xf32, #tpu.memory_space<vmem>>, vector<8x256xf32>
    %254 = arith.mulf %252, %253 : vector<8x256xf32>
    %c8_259 = arith.constant 8 : index
    %c0_260 = arith.constant 0 : index
    %255 = vector.load %arg7[%c8_259, %c0_260] : memref<72x256xf32, #tpu.memory_space<vmem>>, vector<8x256xf32>
    tpu.vector_store %arg7[%c8_259, %c0_260], %254 {strides = array<i32>} : memref<72x256xf32, #tpu.memory_space<vmem>>, vector<8x256xf32>,
    %c15_i32_261 = arith.constant 15 : i32
    %256 = tpu.dynamic_rotate %243 by %c15_i32_261 dim 1 : vector<8x256xf32>, i32 -> vector<8x256xf32>
    %c16_262 = arith.constant 16 : index
    %c0_263 = arith.constant 0 : index
    %257 = vector.load %arg5[%c16_262, %c0_263] : memref<72x256xf32, #tpu.memory_space<vmem>>, vector<8x256xf32>
    %258 = arith.mulf %256, %257 : vector<8x256xf32>
    %c16_264 = arith.constant 16 : index
    %c0_265 = arith.constant 0 : index
    %259 = vector.load %arg7[%c16_264, %c0_265] : memref<72x256xf32, #tpu.memory_space<vmem>>, vector<8x256xf32>
    tpu.vector_store %arg7[%c16_264, %c0_265], %258 {strides = array<i32>} : memref<72x256xf32, #tpu.memory_space<vmem>>, vector<8x256xf32>,
    %c1_i32_266 = arith.constant 1 : i32
    %260 = tpu.dynamic_rotate %243 by %c1_i32_266 dim 1 : vector<8x256xf32>, i32 -> vector<8x256xf32>
    %c24_267 = arith.constant 24 : index
    %c0_268 = arith.constant 0 : index
    %261 = vector.load %arg5[%c24_267, %c0_268] : memref<72x256xf32, #tpu.memory_space<vmem>>, vector<8x256xf32>
    %262 = arith.mulf %260, %261 : vector<8x256xf32>
    %c24_269 = arith.constant 24 : index
    %c0_270 = arith.constant 0 : index
    %263 = vector.load %arg7[%c24_269, %c0_270] : memref<72x256xf32, #tpu.memory_space<vmem>>, vector<8x256xf32>
    tpu.vector_store %arg7[%c24_269, %c0_270], %262 {strides = array<i32>} : memref<72x256xf32, #tpu.memory_space<vmem>>, vector<8x256xf32>,
    %c32_271 = arith.constant 32 : index
    %c0_272 = arith.constant 0 : index
    %264 = vector.load %arg7[%c32_271, %c0_272] : memref<72x256xf32, #tpu.memory_space<vmem>>, vector<8x256xf32>
    tpu.vector_store %arg7[%c32_271, %c0_272], %243 {strides = array<i32>} : memref<72x256xf32, #tpu.memory_space<vmem>>, vector<8x256xf32>,
    %c255_i32_273 = arith.constant 255 : i32
    %265 = tpu.dynamic_rotate %243 by %c255_i32_273 dim 1 : vector<8x256xf32>, i32 -> vector<8x256xf32>
    %c40_274 = arith.constant 40 : index
    %c0_275 = arith.constant 0 : index
    %266 = vector.load %arg5[%c40_274, %c0_275] : memref<72x256xf32, #tpu.memory_space<vmem>>, vector<8x256xf32>
    %267 = arith.mulf %265, %266 : vector<8x256xf32>
    %c40_276 = arith.constant 40 : index
    %c0_277 = arith.constant 0 : index
    %268 = vector.load %arg7[%c40_276, %c0_277] : memref<72x256xf32, #tpu.memory_space<vmem>>, vector<8x256xf32>
    tpu.vector_store %arg7[%c40_276, %c0_277], %267 {strides = array<i32>} : memref<72x256xf32, #tpu.memory_space<vmem>>, vector<8x256xf32>,
    %c241_i32_278 = arith.constant 241 : i32
    %269 = tpu.dynamic_rotate %243 by %c241_i32_278 dim 1 : vector<8x256xf32>, i32 -> vector<8x256xf32>
    %c48_279 = arith.constant 48 : index
    %c0_280 = arith.constant 0 : index
    %270 = vector.load %arg5[%c48_279, %c0_280] : memref<72x256xf32, #tpu.memory_space<vmem>>, vector<8x256xf32>
    %271 = arith.mulf %269, %270 : vector<8x256xf32>
    %c48_281 = arith.constant 48 : index
    %c0_282 = arith.constant 0 : index
    %272 = vector.load %arg7[%c48_281, %c0_282] : memref<72x256xf32, #tpu.memory_space<vmem>>, vector<8x256xf32>
    tpu.vector_store %arg7[%c48_281, %c0_282], %271 {strides = array<i32>} : memref<72x256xf32, #tpu.memory_space<vmem>>, vector<8x256xf32>,
    %c240_i32_283 = arith.constant 240 : i32
    %273 = tpu.dynamic_rotate %243 by %c240_i32_283 dim 1 : vector<8x256xf32>, i32 -> vector<8x256xf32>
    %c56_284 = arith.constant 56 : index
    %c0_285 = arith.constant 0 : index
    %274 = vector.load %arg5[%c56_284, %c0_285] : memref<72x256xf32, #tpu.memory_space<vmem>>, vector<8x256xf32>
    %275 = arith.mulf %273, %274 : vector<8x256xf32>
    %c56_286 = arith.constant 56 : index
    %c0_287 = arith.constant 0 : index
    %276 = vector.load %arg7[%c56_286, %c0_287] : memref<72x256xf32, #tpu.memory_space<vmem>>, vector<8x256xf32>
    tpu.vector_store %arg7[%c56_286, %c0_287], %275 {strides = array<i32>} : memref<72x256xf32, #tpu.memory_space<vmem>>, vector<8x256xf32>,
    %c239_i32_288 = arith.constant 239 : i32
    %277 = tpu.dynamic_rotate %243 by %c239_i32_288 dim 1 : vector<8x256xf32>, i32 -> vector<8x256xf32>
    %c64_289 = arith.constant 64 : index
    %c0_290 = arith.constant 0 : index
    %278 = vector.load %arg5[%c64_289, %c0_290] : memref<72x256xf32, #tpu.memory_space<vmem>>, vector<8x256xf32>
    %279 = arith.mulf %277, %278 : vector<8x256xf32>
    %c64_291 = arith.constant 64 : index
    %c0_292 = arith.constant 0 : index
    %280 = vector.load %arg7[%c64_291, %c0_292] : memref<72x256xf32, #tpu.memory_space<vmem>>, vector<8x256xf32>
    tpu.vector_store %arg7[%c64_291, %c0_292], %279 {strides = array<i32>} : memref<72x256xf32, #tpu.memory_space<vmem>>, vector<8x256xf32>,
    %c0_293 = arith.constant 0 : index
    %c0_294 = arith.constant 0 : index
    %281 = vector.load %arg7[%c0_293, %c0_294] : memref<72x256xf32, #tpu.memory_space<vmem>>, vector<72x256xf32>
    %282 = arith.truncf %281 : vector<72x256xf32> to vector<72x256xbf16>
    %cst_295 = arith.constant dense<0.000000e+00> : vector<8x256xf32>
    %283 = tpu.matmul %245, %282, %cst_295 {dimension_numbers = #tpu.dot_dimension_numbers<[1], [0], [0], [1], [0, 0, 1, 1], [], []>} : vector<8x72xbf16>, vector<72x256xbf16>, vector<8x256xf32> -> vector<8x256xf32>
    %284 = vector.broadcast %247 : vector<8x1xf32> to vector<8x256xf32>
    %285 = arith.addf %283, %284 : vector<8x256xf32>
    %c0_296 = arith.constant 0 : index
    %c0_297 = arith.constant 0 : index
    %c0_298 = arith.constant 0 : index
    %286 = vector.load %arg6[%c0_296, %c0_297, %c0_298] : memref<1x8x256xf32, #tpu.memory_space<vmem>>, vector<1x8x256xf32>
    %287 = vector.shape_cast %286 : vector<1x8x256xf32> to vector<8x256xf32>
    %288 = vector.shape_cast %285 : vector<8x256xf32> to vector<1x8x256xf32>
    tpu.vector_store %arg6[%c0_296, %c0_297, %c0_298], %288 {strides = array<i32>} : memref<1x8x256xf32, #tpu.memory_space<vmem>>, vector<1x8x256xf32>,
    return
  }
  func.func @transform_0(%arg0: i32) -> (i32, i32, i32) {
    %c0_i32 = arith.constant 0 : i32
    %c0_i32_0 = arith.constant 0 : i32
    %c0_i32_1 = arith.constant 0 : i32
    return %arg0, %c0_i32, %c0_i32_0 : i32, i32, i32
  }
  func.func @transform_1(%arg0: i32) -> (i32, i32, i32) {
    %c0_i32 = arith.constant 0 : i32
    %c0_i32_0 = arith.constant 0 : i32
    %c0_i32_1 = arith.constant 0 : i32
    %c0_i32_2 = arith.constant 0 : i32
    return %c0_i32, %c0_i32_0, %c0_i32_1 : i32, i32, i32
  }
  func.func @transform_2(%arg0: i32) -> (i32, i32, i32) {
    %c0_i32 = arith.constant 0 : i32
    %c0_i32_0 = arith.constant 0 : i32
    %c0_i32_1 = arith.constant 0 : i32
    %c0_i32_2 = arith.constant 0 : i32
    return %c0_i32, %c0_i32_0, %c0_i32_1 : i32, i32, i32
  }
  func.func @transform_3(%arg0: i32) -> i32 {
    %c0_i32 = arith.constant 0 : i32
    %c0_i32_0 = arith.constant 0 : i32
    return %c0_i32 : i32
  }
  func.func @transform_4(%arg0: i32) -> (i32, i32) {
    %c0_i32 = arith.constant 0 : i32
    %c0_i32_0 = arith.constant 0 : i32
    %c0_i32_1 = arith.constant 0 : i32
    return %c0_i32, %c0_i32_0 : i32, i32
  }
  func.func @transform_5(%arg0: i32) -> (i32, i32, i32) {
    %c0_i32 = arith.constant 0 : i32
    %c0_i32_0 = arith.constant 0 : i32
    %c0_i32_1 = arith.constant 0 : i32
    return %arg0, %c0_i32, %c0_i32_0 : i32, i32, i32
  }
}

</mosaic_0001>

<bundles_post_ra>
// kernel: encoder_forward.1
= control target key start
LH: loop header
LB: loop body
LE: loop exit
PB: predicated region body
PF: predicated region fallthrough
CT: control target
= control target key end

     0   :  { %10 = vsyncpa [#allocation4], 0  ;;  %s1613_s18 = smov 0   ;;  %s2333_s0 = inlined_call_operand.vmem [shape: f32[2,8,256], index: 0, kind: input, shape index: {}]   ;;  %s2334_s1 = inlined_call_operand.vmem [shape: bf16[6,8,72], index: 1, kind: input, shape index: {}]   ;;  %s2335_s2 = inlined_call_operand.vmem [shape: f32[6,8,1], index: 2, kind: input, shape index: {}]   ;;  %s2336_s3 = inlined_call_operand.vmem [shape: f32[5], index: 3, kind: input, shape index: {}]   ;;  %s2337_s4 = inlined_call_operand.vmem [shape: f32[72,256], index: 4, kind: input, shape index: {}]   ;;  %s2338_s5 = inlined_call_operand.vmem [shape: f32[2,8,256], index: 5, kind: output, shape index: {}]  }
   0x1 LB: > { %s1475_s19 = sadd.s32 4294967295, %s1571_s18   ;;  %p1477_p0 = scmp.ge.s32.totalorder %s1571_s18, 1  ;;  %s1571_s18 = sphi %s1613_s18, %s16_s18  }
   0x2   : > { %p157_p1 = scmp.lt.s32.totalorder %s1571_s18, 3  ;;  %s176_s22 = sshll.u32 %s2336_s3, 4  ;;  %s177_s22 = int_to_ptr.vmem [resolvable:$true] %s176_s22 }
   0x3   : > { %p1524_p3 = scmp.eq.s32.totalorder %s1475_s19, 0  ;;  %s1546_s24 = scalar_lea.vmem %s177_s22, 16 }
   0x4   : > { %p1624_p2 = pnand %p1477_p0, %p157_p1  ;;  %p1547_p6 = scmp.ne.s32.totalorder %s177_s22, %s1546_s24 }
   0x5   : > { %p1554_p10 = scmp.lt.s32.totalorder %s177_s22, %s177_s22  ;;  %p1555_p11 = scmp.lt.s32.totalorder %s1546_s24, %s1546_s24 }
   0x6   : > { %p1520_p4 = pneg %p1624_p2 }
   0x7   : > { %p1556_p12 = por %p1555_p11, %p1554_p10 }
   0x8   : > { %p1521_p5 = pnand %p1524_p3, %p1520_p4 }
   0xa   : > { %p1548_p7 = pneg %p1521_p5 }
   0xc   : > { %p1549_p8 = pnand %p1548_p7, %p1547_p6 }
   0xe   : > { %p1550_p9 = pneg %p1549_p8 }
  0x10   : > { %p1557_p13 = pnand %p1556_p12, %p1550_p9 }
  0x12   : > { %1560 = shalt.err (!%p1557_p13)
}
  0x13   : > { %s1573_s25 = smov [#allocation3]   ;;  %200 = sbr.rel (%p1624_p2) target bundleno = 2260 (0x8d4), region = 40 }
  0x14   : > { %1523 = dma.vmem_to_smem (!%p1521_p5), %s177_s22, 16, %s1573_s25, [#allocation4]  }
  0x1a   : > { %1566 = dma.done.wait (%p1524_p3), [#allocation4], 16  }
  0x1b   : > { %1568 = vsyncadd (%p1524_p3), [#allocation4], 4294967280 }
  0x1c   : > { %206 = sfence }
  0x1d   : > { %p229_p0 = scmp.lt.s32.totalorder %s1475_s19, 1  ;;  %s1574_s30 = smov 16   ;;  %v1580_v2 = vmov 0   ;;  %v243_v3 = vld [vmem:[%s2335_s2] sm:$0xff]  ;;  %v248_v4 = vlaneseq  ;;  %v1693_v8 = vld [vmem:[%s2337_s4 + $0x8] sm:$0xff]  ;;  %v1698_v9 = vld [vmem:[%s2337_s4 + $0x18] sm:$0xff] }
  0x1e   : > { %s1575_s6 = smov 17   ;;  %s1576_s7 = smov 15   ;;  %428 = vmatprep.mubr.bf16.mxu0 %v1580_v2  ;;  %1544 = vset.pattern.permute.xlu0 %v1580_v2  ;;  %v1703_v10 = vld [vmem:[%s2337_s4] sm:$0xff]  ;;  %v1708_v11 = vld [vmem:[%s2337_s4 + $0x10] sm:$0xff]  ;;  %v1732_v27 = vld [vmem:[%s2337_s4 + $0x28] sm:$0xff]  ;;  %vm389_vm8 = vcmask 1043456  }
  0x1f   : > { %s2341_s19 = smov (!%p229_p0, %s1475_s19), 1  ;;  %s1577_s8 = smov 1   ;;  %621 = vmatprep.mubr.bf16.mxu1 %v1580_v2  ;;  %1545 = vset.pattern.permute.xlu1 %v1580_v2  ;;  %v1686_v5 = vand.u32 127, %v248_v4  ;;  %v1726_v26 = vld [vmem:[%s2337_s4 + $0x20] sm:$0xff]  ;;  %v1741_v30 = vld [vmem:[%s2337_s4 + $0x30] sm:$0xff]  ;;  %v1746_v31 = vld [vmem:[%s2337_s4 + $0x38] sm:$0xff] }
  0x20   : > { %s1514_s26 = sshll.u32 %s2341_s19, 4  ;;  %s1578_s9 = smov 127   ;;  %v1760_v40 = vld [vmem:[%s2337_s4 + $0x50] sm:$0xff]  ;;  %v1765_v41 = vld [vmem:[%s2337_s4 + $0x58] sm:$0xff]  ;;  %v1779_v54 = vld [vmem:[%s2337_s4 + $0x60] sm:$0xff]  ;;  %vm385_vm9 = vcmask 588800  }
  0x21   : > { %s233_s29 = scalar_lea.vmem %s2333_s0, %s1514_s26  ;;  %s1579_s10 = smov 113   ;;  %vm263_vm0 = vcmp.lt.s32.totalorder %v1686_v5, 16  ;;  %vm250_vm1 = vcmp.lt.s32.totalorder %v1686_v5, 17  ;;  %vm276_vm2 = vcmp.lt.s32.totalorder %v1686_v5, 15  ;;  %vm289_vm3 = vcmp.lt.s32.totalorder %v1686_v5, 1  ;;  %v1785_v55 = vld [vmem:[%s2337_s4 + $0x68] sm:$0xff] }
  0x22   : > { %v1643_v0 = vld [vmem:[%s233_s29] sm:$0xff]  ;;  %v1649_v1 = vld [vmem:[%s233_s29 + $0x8] sm:$0xff]  ;;  %s1581_s11 = smov 112   ;;  %s1582_s12 = smov 111   ;;  %vm304_vm4 = vcmp.lt.s32.totalorder %v1686_v5, 127  ;;  %vm317_vm5 = vcmp.lt.s32.totalorder %v1686_v5, 113 }
  0x23   : > { %259 = vrot.lane.b32.xlu1 %v1643_v0, %s1574_s30  ;;  %244 = vrot.lane.b32.xlu0 %v1643_v0, %s1575_s6  ;;  %vm330_vm6 = vcmp.lt.s32.totalorder %v1686_v5, 112  ;;  %v1794_v58 = vld [vmem:[%s2337_s4 + $0x70] sm:$0xff]  ;;  %v1799_v59 = vld [vmem:[%s2337_s4 + $0x78] sm:$0xff]  ;;  %vm343_vm7 = vcmp.lt.s32.totalorder %v1686_v5, 111  ;;  %s437_s23 = sld [smem:[#allocation3]]  ;;  %s1492_s29 = sld [smem:[#allocation3 + $0x1]] }
  0x24   : > { %s1497_s17 = sld [smem:[#allocation3 + $0x2]]  ;;  %s1502_s24 = sld [smem:[#allocation3 + $0x3]] }
  0x25   : > { %s1507_s13 = sld [smem:[#allocation3 + $0x4]] }
  0x27   : > { %261 = vrot.lane.b32.xlu1 %v1649_v1, %s1574_s30  ;;  %246 = vrot.lane.b32.xlu0 %v1649_v1, %s1575_s6 }
  0x2b   : > { %274 = vrot.lane.b32.xlu1 %v1649_v1, %s1576_s7  ;;  %272 = vrot.lane.b32.xlu0 %v1643_v0, %s1576_s7 }
  0x2f   : > { %287 = vrot.lane.b32.xlu1 %v1649_v1, %s1577_s8  ;;  %285 = vrot.lane.b32.xlu0 %v1643_v0, %s1577_s8 }
  0x33   : > { %302 = vrot.lane.b32.xlu1 %v1649_v1, %s1578_s9  ;;  %300 = vrot.lane.b32.xlu0 %v1643_v0, %s1578_s9 }
  0x37   : > { %315 = vrot.lane.b32.xlu1 %v1649_v1, %s1579_s10  ;;  %313 = vrot.lane.b32.xlu0 %v1643_v0, %s1579_s10 }
  0x3b   : > { %328 = vrot.lane.b32.xlu1 %v1649_v1, %s1581_s11  ;;  %326 = vrot.lane.b32.xlu0 %v1643_v0, %s1581_s11 }
  0x3f   : > { %341 = vrot.lane.b32.xlu1 %v1649_v1, %s1582_s12  ;;  %339 = vrot.lane.b32.xlu0 %v1643_v0, %s1582_s12 }
  0x43   : > { %382 = vperm.xlu0 %1544, %v243_v3  }
  0x95   : > { %v260_v6 = vpop.permute.xlu1 %259  ;;  %v245_v7 = vpop.permute.xlu0 %244 }
  0x99   : > { %v262_v12 = vpop.permute.xlu1 %261  ;;  %v247_v13 = vpop.permute.xlu0 %246 }
  0x9a   : > { %v265_v14 = vsel %vm263_vm0, %v262_v12, %v260_v6  ;;  %v252_v15 = vsel %vm250_vm1, %v247_v13, %v245_v7  ;;  %v251_v16 = vsel %vm250_vm1, %v245_v7, %v247_v13  ;;  %v264_v17 = vsel %vm263_vm0, %v260_v6, %v262_v12  ;;  %v1813_v6 = vld [vmem:[%s2337_s4 + $0x80] sm:$0xff]  ;;  %v1818_v7 = vld [vmem:[%s2337_s4 + $0x88] sm:$0xff] }
  0x9b   : > { %v256_v18 = vmul.f32 %v1693_v8, %v251_v16  ;;  %v269_v19 = vmul.f32 %v1698_v9, %v264_v17  ;;  %v255_v20 = vmul.f32 %v1703_v10, %v252_v15  ;;  %v268_v21 = vmul.f32 %v1708_v11, %v265_v14 }
  0x9d   : > { %v275_v22 = vpop.permute.xlu1 %274  ;;  %v273_v23 = vpop.permute.xlu0 %272  ;;  %v371_v24 = vpack.c.bf16 %v269_v19, %v256_v18  ;;  %v370_v25 = vpack.c.bf16 %v268_v21, %v255_v20 }
  0x9e   : > { %v277_v28 = vsel %vm276_vm2, %v273_v23, %v275_v22  ;;  %v278_v29 = vsel %vm276_vm2, %v275_v22, %v273_v23  ;;  %v242_v23 = vld [vmem:[%s2334_s1] sm:$0xf] }
  0x9f   : > { %396 = vmatprep.subr.bf16.mxu0 %v371_v24  ;;  %v281_v36 = vmul.f32 %v1726_v26, %v278_v29  ;;  %v282_v37 = vmul.f32 %v1732_v27, %v277_v28  ;;  %v440_v28 = vstv %s437_s23 }
  0xa0   : > { %397 = vmatpush1.bf16.msra.mxu0 %v370_v25 }
  0xa1   : > { %v288_v32 = vpop.permute.xlu1 %287  ;;  %v286_v33 = vpop.permute.xlu0 %285 }
  0xa2   : > { %v290_v34 = vsel %vm289_vm3, %v286_v33, %v288_v32  ;;  %v291_v35 = vsel %vm289_vm3, %v288_v32, %v286_v33 }
  0xa3   : > { %v294_v38 = vmul.f32 %v1741_v30, %v291_v35  ;;  %v295_v39 = vmul.f32 %v1746_v31, %v290_v34 }
  0xa5   : > { %v303_v42 = vpop.permute.xlu1 %302  ;;  %v301_v43 = vpop.permute.xlu0 %300  ;;  %v373_v44 = vpack.c.bf16 %v295_v39, %v282_v37  ;;  %v372_v45 = vpack.c.bf16 %v294_v38, %v281_v36 }
  0xa6   : > { %v305_v46 = vsel %vm304_vm4, %v301_v43, %v303_v42  ;;  %v306_v47 = vsel %vm304_vm4, %v303_v42, %v301_v43  ;;  %v1489_v42 = vld [vmem:[%s2335_s2 + $0x8] sm:$0xff] }
  0xa7   : > { %v309_v48 = vmul.f32 %v1760_v40, %v305_v46  ;;  %v310_v49 = vmul.f32 %v1765_v41, %v306_v47  ;;  %398 = vmatprep.subr.bf16.mxu0 %v373_v44 }
  0xa8   : > { %399 = vmatpush1.bf16.msra.mxu0 %v372_v45 }
  0xa9   : > { %v316_v50 = vpop.permute.xlu1 %315  ;;  %v314_v51 = vpop.permute.xlu0 %313  ;;  %v375_v52 = vpack.c.bf16 %v310_v49, %v1649_v1  ;;  %v374_v53 = vpack.c.bf16 %v309_v48, %v1643_v0 }
  0xaa   : > { %v318_v56 = vsel %vm317_vm5, %v314_v51, %v316_v50  ;;  %v319_v57 = vsel %vm317_vm5, %v316_v50, %v314_v51 }
  0xab   : > { %400 = vmatprep.subr.bf16.mxu0 %v375_v52  ;;  %v322_v0 = vmul.f32 %v1779_v54, %v318_v56  ;;  %v323_v1 = vmul.f32 %v1785_v55, %v319_v57 }
  0xac   : > { %401 = vmatpush1.bf16.msra.mxu0 %v374_v53 }
  0xad   : > { %v329_v60 = vpop.permute.xlu1 %328  ;;  %v327_v61 = vpop.permute.xlu0 %326 }
  0xae   : > { %v331_v62 = vsel %vm330_vm6, %v327_v61, %v329_v60  ;;  %v332_v63 = vsel %vm330_vm6, %v329_v60, %v327_v61 }
  0xaf   : > { %v335_v3 = vmul.f32 %v1794_v58, %v331_v62  ;;  %v336_v4 = vmul.f32 %v1799_v59, %v332_v63 }
  0xb1   : > { %v342_v12 = vpop.permute.xlu1 %341  ;;  %v340_v13 = vpop.permute.xlu0 %339  ;;  %v377_v14 = vpack.c.bf16 %v336_v4, %v323_v1  ;;  %v376_v15 = vpack.c.bf16 %v335_v3, %v322_v0 }
  0xb2   : > { %v344_v16 = vsel %vm343_vm7, %v340_v13, %v342_v12  ;;  %v345_v17 = vsel %vm343_vm7, %v342_v12, %v340_v13 }
  0xb3   : > { %v348_v18 = vmul.f32 %v1813_v6, %v344_v16  ;;  %v349_v19 = vmul.f32 %v1818_v7, %v345_v17  ;;  %402 = vmatprep.subr.bf16.mxu0 %v377_v14 }
  0xb4   : > { %403 = vmatpush1.bf16.msra.mxu0 %v376_v15 }
  0xb5   : > { %v378_v20 = vpack.c.bf16 %v348_v18, %v348_v18  ;;  %v379_v21 = vpack.c.bf16 %v349_v19, %v349_v19 }
  0xb7   : > { %1486 = vmatprep.subr.msk.bf16.mxu0 %vm389_vm8, %v379_v21  ;;  %v391_v22 = vsel %vm389_vm8, %v378_v20, 0 }
  0xb8   : > { %405 = vmatpush1.bf16.msra.mxu0 %v391_v22 }
  0xbb   : > { %1487 = vmatmul.mubr.msk.bf16.vlgmr.msra.gmra.mrb[0].mxu0 %vm385_vm9, %v242_v23 }
  0xbc   : > { %814 = vmatprep.mubr.bf16.mxu0 %v1580_v2 }
  0xc2   : > { %v383_v24 = vpop.permute.xlu0 %382 }
 0x18e   : > { %v430_v25 = vpop.f32.mrb[0].mxu0 }
 0x18f   : > { %v431_v29 = vadd.f32 %v430_v25, %v383_v24  ;;  %v432_v32 = vpop.f32.mrb[1].mxu0 }
 0x190   : > { %v433_v33 = vadd.f32 %v432_v32, %v383_v24  ;;  %v434_v34 = vpop.f32.mrb[2].mxu0 }
 0x191   : > { %vm438_vm10 = vcmp.ge.f32.partialorder %v431_v29, 0.0  ;;  %v441_v35 = vmul.f32 %v440_v28, %v431_v29  ;;  %v435_v36 = vpop.f32.mrb[3].mxu0 }
 0x192   : > { %v442_v37 = vmul.f32 %v440_v28, %v433_v33  ;;  %vm439_vm11 = vcmp.ge.f32.partialorder %v433_v33, 0.0 }
 0x193   : > { %v1833_v38 = vsel %vm438_vm10, %v431_v29, %v441_v35 }
 0x194   : > { %461 = vrot.lane.b32.xlu0 %v1833_v38, %s1574_s30  ;;  %449 = vrot.lane.b32.xlu1 %v1833_v38, %s1575_s6  ;;  %v1839_v39 = vsel %vm439_vm11, %v433_v33, %v442_v37 }
 0x198   : > { %473 = vrot.lane.b32.xlu0 %v1833_v38, %s1576_s7  ;;  %451 = vrot.lane.b32.xlu1 %v1839_v39, %s1575_s6 }
 0x19c   : > { %485 = vrot.lane.b32.xlu0 %v1833_v38, %s1577_s8  ;;  %463 = vrot.lane.b32.xlu1 %v1839_v39, %s1574_s30 }
 0x1a0   : > { %499 = vrot.lane.b32.xlu0 %v1833_v38, %s1578_s9  ;;  %475 = vrot.lane.b32.xlu1 %v1839_v39, %s1576_s7 }
 0x1a4   : > { %511 = vrot.lane.b32.xlu0 %v1833_v38, %s1579_s10  ;;  %487 = vrot.lane.b32.xlu1 %v1839_v39, %s1577_s8 }
 0x1a8   : > { %523 = vrot.lane.b32.xlu0 %v1833_v38, %s1581_s11  ;;  %501 = vrot.lane.b32.xlu1 %v1839_v39, %s1578_s9 }
 0x1ac   : > { %535 = vrot.lane.b32.xlu0 %v1833_v38, %s1582_s12  ;;  %513 = vrot.lane.b32.xlu1 %v1839_v39, %s1579_s10 }
 0x1b0   : > { %577 = vperm.xlu0 %1544, %v1489_v42   ;;  %525 = vrot.lane.b32.xlu1 %v1839_v39, %s1581_s11 }
 0x1b4   : > { %537 = vrot.lane.b32.xlu1 %v1839_v39, %s1582_s12 }
 0x206   : > { %v462_v43 = vpop.permute.xlu0 %461  ;;  %v450_v44 = vpop.permute.xlu1 %449 }
 0x20a   : > { %v474_v45 = vpop.permute.xlu0 %473  ;;  %v452_v46 = vpop.permute.xlu1 %451 }
 0x20b   : > { %v453_v47 = vsel %vm250_vm1, %v450_v44, %v452_v46  ;;  %v454_v48 = vsel %vm250_vm1, %v452_v46, %v450_v44 }
 0x20c   : > { %v457_v53 = vmul.f32 %v454_v48, %v1703_v10  ;;  %v458_v57 = vmul.f32 %v453_v47, %v1693_v8 }
 0x20e   : > { %v486_v49 = vpop.permute.xlu0 %485  ;;  %v464_v50 = vpop.permute.xlu1 %463 }
 0x20f   : > { %v465_v51 = vsel %vm263_vm0, %v462_v43, %v464_v50  ;;  %v466_v52 = vsel %vm263_vm0, %v464_v50, %v462_v43 }
 0x210   : > { %v469_v56 = vmul.f32 %v466_v52, %v1708_v11  ;;  %v470_v60 = vmul.f32 %v465_v51, %v1698_v9 }
 0x212   : > { %v476_v61 = vpop.permute.xlu1 %475  ;;  %v566_v62 = vpack.c.bf16 %v470_v60, %v458_v57  ;;  %v565_v63 = vpack.c.bf16 %v469_v56, %v457_v53  ;;  %v500_v0 = vpop.permute.xlu0 %499 }
 0x213   : > { %v477_v1 = vsel %vm276_vm2, %v474_v45, %v476_v61  ;;  %v478_v3 = vsel %vm276_vm2, %v476_v61, %v474_v45 }
 0x214   : > { %589 = vmatprep.subr.bf16.mxu1 %v566_v62  ;;  %v481_v14 = vmul.f32 %v478_v3, %v1726_v26  ;;  %v482_v15 = vmul.f32 %v477_v1, %v1732_v27  ;;  %v1488_v62 = vld [vmem:[%s2334_s1 + $0x4] sm:$0xf]  ;;  %v633_v1 = vstv %s1492_s29 }
 0x215   : > { %590 = vmatpush1.bf16.msra.mxu1 %v565_v63 }
 0x216   : > { %v488_v4 = vpop.permute.xlu1 %487  ;;  %v512_v18 = vpop.permute.xlu0 %511 }
 0x217   : > { %v489_v12 = vsel %vm289_vm3, %v486_v49, %v488_v4  ;;  %v490_v13 = vsel %vm289_vm3, %v488_v4, %v486_v49 }
 0x218   : > { %v493_v16 = vmul.f32 %v490_v13, %v1741_v30  ;;  %v494_v17 = vmul.f32 %v489_v12, %v1746_v31 }
 0x21a   : > { %v502_v19 = vpop.permute.xlu1 %501  ;;  %v568_v20 = vpack.c.bf16 %v494_v17, %v482_v15  ;;  %v567_v21 = vpack.c.bf16 %v493_v16, %v481_v14  ;;  %v524_v33 = vpop.permute.xlu0 %523 }
 0x21b   : > { %v503_v22 = vsel %vm304_vm4, %v500_v0, %v502_v19  ;;  %v504_v23 = vsel %vm304_vm4, %v502_v19, %v500_v0  ;;  %v1494_v19 = vld [vmem:[%s2335_s2 + $0x10] sm:$0xff] }
 0x21c   : > { %v507_v24 = vmul.f32 %v503_v22, %v1760_v40  ;;  %v508_v25 = vmul.f32 %v504_v23, %v1765_v41  ;;  %591 = vmatprep.subr.bf16.mxu1 %v568_v20 }
 0x21d   : > { %592 = vmatpush1.bf16.msra.mxu1 %v567_v21 }
 0x21e   : > { %v514_v28 = vpop.permute.xlu1 %513  ;;  %v570_v29 = vpack.c.bf16 %v508_v25, %v1839_v39  ;;  %v569_v32 = vpack.c.bf16 %v507_v24, %v1833_v38  ;;  %v536_v47 = vpop.permute.xlu0 %535 }
 0x21f   : > { %v515_v34 = vsel %vm317_vm5, %v512_v18, %v514_v28  ;;  %v516_v35 = vsel %vm317_vm5, %v514_v28, %v512_v18 }
 0x220   : > { %593 = vmatprep.subr.bf16.mxu1 %v570_v29  ;;  %v519_v43 = vmul.f32 %v515_v34, %v1779_v54  ;;  %v520_v44 = vmul.f32 %v516_v35, %v1785_v55 }
 0x221   : > { %594 = vmatpush1.bf16.msra.mxu1 %v569_v32 }
 0x222   : > { %v526_v36 = vpop.permute.xlu1 %525 }
 0x223   : > { %v527_v37 = vsel %vm330_vm6, %v524_v33, %v526_v36  ;;  %v528_v42 = vsel %vm330_vm6, %v526_v36, %v524_v33 }
 0x224   : > { %v531_v45 = vmul.f32 %v527_v37, %v1794_v58  ;;  %v532_v46 = vmul.f32 %v528_v42, %v1799_v59 }
 0x226   : > { %v538_v48 = vpop.permute.xlu1 %537  ;;  %v572_v49 = vpack.c.bf16 %v532_v46, %v520_v44  ;;  %v571_v50 = vpack.c.bf16 %v531_v45, %v519_v43 }
 0x227   : > { %v539_v51 = vsel %vm343_vm7, %v536_v47, %v538_v48  ;;  %v540_v52 = vsel %vm343_vm7, %v538_v48, %v536_v47 }
 0x228   : > { %v543_v53 = vmul.f32 %v539_v51, %v1813_v6  ;;  %v544_v56 = vmul.f32 %v540_v52, %v1818_v7  ;;  %595 = vmatprep.subr.bf16.mxu1 %v572_v49 }
 0x229   : > { %596 = vmatpush1.bf16.msra.mxu1 %v571_v50 }
 0x22a   : > { %v573_v57 = vpack.c.bf16 %v543_v53, %v543_v53  ;;  %v574_v60 = vpack.c.bf16 %v544_v56, %v544_v56 }
 0x22c   : > { %1490 = vmatprep.subr.msk.bf16.mxu1 %vm389_vm8, %v574_v60  ;;  %v584_v61 = vsel %vm389_vm8, %v573_v57, 0 }
 0x22d   : > { %598 = vmatpush1.bf16.msra.mxu1 %v584_v61 }
 0x22f   : > { %v578_v63 = vpop.permute.xlu0 %577 }
 0x230   : > { %1491 = vmatmul.mubr.msk.bf16.vlgmr.msra.gmra.mrb[0].mxu1 %vm385_vm9, %v1488_v62 }
 0x231   : > { %1009 = vmatprep.mubr.bf16.mxu1 %v1580_v2 }
 0x303   : > { %v623_v0 = vpop.f32.mrb[0].mxu1 }
 0x304   : > { %v624_v3 = vadd.f32 %v623_v0, %v578_v63  ;;  %v625_v4 = vpop.f32.mrb[1].mxu1 }
 0x305   : > { %v626_v12 = vadd.f32 %v625_v4, %v578_v63  ;;  %v627_v13 = vpop.f32.mrb[2].mxu1 }
 0x306   : > { %vm631_vm12 = vcmp.ge.f32.partialorder %v624_v3, 0.0  ;;  %v634_v14 = vmul.f32 %v633_v1, %v624_v3  ;;  %v628_v15 = vpop.f32.mrb[3].mxu1 }
 0x307   : > { %vm632_vm13 = vcmp.ge.f32.partialorder %v626_v12, 0.0  ;;  %v635_v16 = vmul.f32 %v633_v1, %v626_v12 }
 0x308   : > { %v1929_v17 = vsel %vm631_vm12, %v624_v3, %v634_v14 }
 0x309   : > { %v637_v18 = vsel %vm632_vm13, %v626_v12, %v635_v16  ;;  %642 = vrot.lane.b32.xlu1 %v1929_v17, %s1575_s6 }
 0x30a   : > { %644 = vrot.lane.b32.xlu0 %v637_v18, %s1575_s6 }
 0x30d   : > { %654 = vrot.lane.b32.xlu1 %v1929_v17, %s1574_s30 }
 0x30e   : > { %656 = vrot.lane.b32.xlu0 %v637_v18, %s1574_s30 }
 0x311   : > { %666 = vrot.lane.b32.xlu1 %v1929_v17, %s1576_s7 }
 0x312   : > { %668 = vrot.lane.b32.xlu0 %v637_v18, %s1576_s7 }
 0x315   : > { %678 = vrot.lane.b32.xlu1 %v1929_v17, %s1577_s8 }
 0x316   : > { %680 = vrot.lane.b32.xlu0 %v637_v18, %s1577_s8 }
 0x319   : > { %692 = vrot.lane.b32.xlu1 %v1929_v17, %s1578_s9 }
 0x31a   : > { %694 = vrot.lane.b32.xlu0 %v637_v18, %s1578_s9 }
 0x31d   : > { %704 = vrot.lane.b32.xlu1 %v1929_v17, %s1579_s10 }
 0x31e   : > { %706 = vrot.lane.b32.xlu0 %v637_v18, %s1579_s10 }
 0x321   : > { %716 = vrot.lane.b32.xlu1 %v1929_v17, %s1581_s11 }
 0x322   : > { %718 = vrot.lane.b32.xlu0 %v637_v18, %s1581_s11 }
 0x325   : > { %728 = vrot.lane.b32.xlu1 %v1929_v17, %s1582_s12 }
 0x326   : > { %730 = vrot.lane.b32.xlu0 %v637_v18, %s1582_s12 }
 0x329   : > { %770 = vperm.xlu1 %1545, %v1494_v19  }
 0x37b   : > { %v643_v20 = vpop.permute.xlu1 %642 }
 0x37c   : > { %v645_v21 = vpop.permute.xlu0 %644 }
 0x37d   : > { %v646_v22 = vsel %vm250_vm1, %v643_v20, %v645_v21  ;;  %v647_v23 = vsel %vm250_vm1, %v645_v21, %v643_v20 }
 0x37e   : > { %v650_v32 = vmul.f32 %v647_v23, %v1703_v10  ;;  %v651_v33 = vmul.f32 %v646_v22, %v1693_v8 }
 0x37f   : > { %v655_v24 = vpop.permute.xlu1 %654 }
 0x380   : > { %v657_v25 = vpop.permute.xlu0 %656 }
 0x381   : > { %v658_v28 = vsel %vm263_vm0, %v655_v24, %v657_v25  ;;  %v659_v29 = vsel %vm263_vm0, %v657_v25, %v655_v24 }
 0x382   : > { %v662_v34 = vmul.f32 %v659_v29, %v1708_v11  ;;  %v663_v35 = vmul.f32 %v658_v28, %v1698_v9 }
 0x383   : > { %v667_v36 = vpop.permute.xlu1 %666 }
 0x384   : > { %v758_v37 = vpack.c.bf16 %v662_v34, %v650_v32  ;;  %v669_v42 = vpop.permute.xlu0 %668  ;;  %v759_v43 = vpack.c.bf16 %v663_v35, %v651_v33 }
 0x385   : > { %v670_v44 = vsel %vm276_vm2, %v667_v36, %v669_v42  ;;  %v671_v45 = vsel %vm276_vm2, %v669_v42, %v667_v36 }
 0x386   : > { %782 = vmatprep.subr.bf16.mxu0 %v759_v43  ;;  %v674_v50 = vmul.f32 %v671_v45, %v1726_v26  ;;  %v675_v51 = vmul.f32 %v670_v44, %v1732_v27  ;;  %v1493_v43 = vld [vmem:[%s2334_s1 + $0x8] sm:$0xf] }
 0x387   : > { %783 = vmatpush1.bf16.msra.mxu0 %v758_v37  ;;  %v679_v46 = vpop.permute.xlu1 %678 }
 0x388   : > { %v681_v47 = vpop.permute.xlu0 %680 }
 0x389   : > { %v682_v48 = vsel %vm289_vm3, %v679_v46, %v681_v47  ;;  %v683_v49 = vsel %vm289_vm3, %v681_v47, %v679_v46  ;;  %v826_v46 = vstv %s1497_s17 }
 0x38a   : > { %v686_v52 = vmul.f32 %v683_v49, %v1741_v30  ;;  %v687_v53 = vmul.f32 %v682_v48, %v1746_v31 }
 0x38b   : > { %v693_v56 = vpop.permute.xlu1 %692 }
 0x38c   : > { %v760_v57 = vpack.c.bf16 %v686_v52, %v674_v50  ;;  %v695_v60 = vpop.permute.xlu0 %694  ;;  %v761_v61 = vpack.c.bf16 %v687_v53, %v675_v51 }
 0x38d   : > { %v696_v62 = vsel %vm304_vm4, %v693_v56, %v695_v60  ;;  %v697_v63 = vsel %vm304_vm4, %v695_v60, %v693_v56 }
 0x38e   : > { %v700_v0 = vmul.f32 %v696_v62, %v1760_v40  ;;  %v701_v1 = vmul.f32 %v697_v63, %v1765_v41  ;;  %784 = vmatprep.subr.bf16.mxu0 %v761_v61 }
 0x38f   : > { %785 = vmatpush1.bf16.msra.mxu0 %v760_v57  ;;  %v705_v3 = vpop.permute.xlu1 %704 }
 0x390   : > { %v762_v4 = vpack.c.bf16 %v700_v0, %v1929_v17  ;;  %v707_v12 = vpop.permute.xlu0 %706  ;;  %v763_v13 = vpack.c.bf16 %v701_v1, %v637_v18 }
 0x391   : > { %v708_v14 = vsel %vm317_vm5, %v705_v3, %v707_v12  ;;  %v709_v15 = vsel %vm317_vm5, %v707_v12, %v705_v3 }
 0x392   : > { %786 = vmatprep.subr.bf16.mxu0 %v763_v13  ;;  %v712_v17 = vmul.f32 %v708_v14, %v1779_v54  ;;  %v713_v18 = vmul.f32 %v709_v15, %v1785_v55 }
 0x393   : > { %787 = vmatpush1.bf16.msra.mxu0 %v762_v4  ;;  %v717_v16 = vpop.permute.xlu1 %716 }
 0x394   : > { %v719_v19 = vpop.permute.xlu0 %718 }
 0x395   : > { %v720_v20 = vsel %vm330_vm6, %v717_v16, %v719_v19  ;;  %v721_v21 = vsel %vm330_vm6, %v719_v19, %v717_v16 }
 0x396   : > { %v724_v22 = vmul.f32 %v720_v20, %v1794_v58  ;;  %v725_v23 = vmul.f32 %v721_v21, %v1799_v59 }
 0x397   : > { %v729_v24 = vpop.permute.xlu1 %728 }
 0x398   : > { %v764_v25 = vpack.c.bf16 %v724_v22, %v712_v17  ;;  %v731_v28 = vpop.permute.xlu0 %730  ;;  %v765_v29 = vpack.c.bf16 %v725_v23, %v713_v18 }
 0x399   : > { %v732_v32 = vsel %vm343_vm7, %v729_v24, %v731_v28  ;;  %v733_v33 = vsel %vm343_vm7, %v731_v28, %v729_v24 }
 0x39a   : > { %v736_v34 = vmul.f32 %v732_v32, %v1813_v6  ;;  %v737_v35 = vmul.f32 %v733_v33, %v1818_v7  ;;  %788 = vmatprep.subr.bf16.mxu0 %v765_v29 }
 0x39b   : > { %789 = vmatpush1.bf16.msra.mxu0 %v764_v25 }
 0x39c   : > { %v766_v36 = vpack.c.bf16 %v736_v34, %v736_v34  ;;  %v767_v37 = vpack.c.bf16 %v737_v35, %v737_v35 }
 0x39e   : > { %1495 = vmatprep.subr.msk.bf16.mxu0 %vm389_vm8, %v767_v37  ;;  %v777_v42 = vsel %vm389_vm8, %v766_v36, 0 }
 0x39f   : > { %791 = vmatpush1.bf16.msra.mxu0 %v777_v42 }
 0x3a2   : > { %1496 = vmatmul.mubr.msk.bf16.vlgmr.msra.gmra.mrb[4].mxu0 %vm385_vm9, %v1493_v43 }
 0x3a3   : > { %1202 = vmatprep.mubr.bf16.mxu0 %v1580_v2 }
 0x3a8   : > { %v771_v44 = vpop.permute.xlu1 %770 }
 0x475   : > { %v816_v45 = vpop.f32.mrb[4].mxu0 }
 0x476   : > { %v817_v47 = vadd.f32 %v816_v45, %v771_v44  ;;  %v818_v48 = vpop.f32.mrb[5].mxu0 }
 0x477   : > { %v819_v49 = vadd.f32 %v818_v48, %v771_v44  ;;  %v820_v50 = vpop.f32.mrb[6].mxu0 }
 0x478   : > { %vm824_vm14 = vcmp.ge.f32.partialorder %v817_v47, 0.0  ;;  %v827_v51 = vmul.f32 %v826_v46, %v817_v47  ;;  %v821_v52 = vpop.f32.mrb[7].mxu0 }
 0x479   : > { %vm825_vm15 = vcmp.ge.f32.partialorder %v819_v49, 0.0  ;;  %v828_v53 = vmul.f32 %v826_v46, %v819_v49 }
 0x47a   : > { %v829_v56 = vsel %vm824_vm14, %v817_v47, %v827_v51 }
 0x47b   : > { %v830_v57 = vsel %vm825_vm15, %v819_v49, %v828_v53  ;;  %v2015_v60 = vadd.f32 %v829_v56, %v1833_v38  ;;  %v1499_v38 = vld [vmem:[%s2335_s2 + $0x18] sm:$0xff] }
 0x47c   : > { %v2018_v61 = vadd.f32 %v830_v57, %v1839_v39 }
 0x47d   : > { %837 = vrot.lane.b32.xlu0 %v2015_v60, %s1575_s6 }
 0x47e   : > { %839 = vrot.lane.b32.xlu1 %v2018_v61, %s1575_s6 }
 0x481   : > { %849 = vrot.lane.b32.xlu0 %v2015_v60, %s1574_s30 }
 0x482   : > { %851 = vrot.lane.b32.xlu1 %v2018_v61, %s1574_s30 }
 0x485   : > { %861 = vrot.lane.b32.xlu0 %v2015_v60, %s1576_s7 }
 0x486   : > { %863 = vrot.lane.b32.xlu1 %v2018_v61, %s1576_s7 }
 0x489   : > { %873 = vrot.lane.b32.xlu0 %v2015_v60, %s1577_s8 }
 0x48a   : > { %875 = vrot.lane.b32.xlu1 %v2018_v61, %s1577_s8 }
 0x48d   : > { %887 = vrot.lane.b32.xlu0 %v2015_v60, %s1578_s9 }
 0x48e   : > { %889 = vrot.lane.b32.xlu1 %v2018_v61, %s1578_s9 }
 0x491   : > { %899 = vrot.lane.b32.xlu0 %v2015_v60, %s1579_s10 }
 0x492   : > { %901 = vrot.lane.b32.xlu1 %v2018_v61, %s1579_s10 }
 0x495   : > { %911 = vrot.lane.b32.xlu0 %v2015_v60, %s1581_s11 }
 0x496   : > { %913 = vrot.lane.b32.xlu1 %v2018_v61, %s1581_s11 }
 0x499   : > { %923 = vrot.lane.b32.xlu0 %v2015_v60, %s1582_s12 }
 0x49a   : > { %925 = vrot.lane.b32.xlu1 %v2018_v61, %s1582_s12 }
 0x49d   : > { %965 = vperm.xlu0 %1544, %v1499_v38  }
 0x4ef   : > { %v838_v39 = vpop.permute.xlu0 %837 }
 0x4f0   : > { %v840_v62 = vpop.permute.xlu1 %839 }
 0x4f1   : > { %v841_v63 = vsel %vm250_vm1, %v838_v39, %v840_v62  ;;  %v842_v0 = vsel %vm250_vm1, %v840_v62, %v838_v39 }
 0x4f2   : > { %v845_v13 = vmul.f32 %v842_v0, %v1703_v10  ;;  %v846_v14 = vmul.f32 %v841_v63, %v1693_v8 }
 0x4f3   : > { %v850_v1 = vpop.permute.xlu0 %849 }
 0x4f4   : > { %v852_v3 = vpop.permute.xlu1 %851 }
 0x4f5   : > { %v853_v4 = vsel %vm263_vm0, %v850_v1, %v852_v3  ;;  %v854_v12 = vsel %vm263_vm0, %v852_v3, %v850_v1 }
 0x4f6   : > { %v857_v15 = vmul.f32 %v854_v12, %v1708_v11  ;;  %v858_v16 = vmul.f32 %v853_v4, %v1698_v9 }
 0x4f7   : > { %v862_v19 = vpop.permute.xlu0 %861 }
 0x4f8   : > { %v953_v20 = vpack.c.bf16 %v857_v15, %v845_v13  ;;  %v864_v21 = vpop.permute.xlu1 %863  ;;  %v954_v17 = vpack.c.bf16 %v858_v16, %v846_v14 }
 0x4f9   : > { %v865_v18 = vsel %vm276_vm2, %v862_v19, %v864_v21  ;;  %v866_v22 = vsel %vm276_vm2, %v864_v21, %v862_v19 }
 0x4fa   : > { %977 = vmatprep.subr.bf16.mxu1 %v954_v17  ;;  %v869_v29 = vmul.f32 %v866_v22, %v1726_v26  ;;  %v870_v32 = vmul.f32 %v865_v18, %v1732_v27  ;;  %v1498_v17 = vld [vmem:[%s2334_s1 + $0xc] sm:$0xf] }
 0x4fb   : > { %978 = vmatpush1.bf16.msra.mxu1 %v953_v20  ;;  %v874_v23 = vpop.permute.xlu0 %873 }
 0x4fc   : > { %v876_v24 = vpop.permute.xlu1 %875 }
 0x4fd   : > { %v877_v25 = vsel %vm289_vm3, %v874_v23, %v876_v24  ;;  %v878_v28 = vsel %vm289_vm3, %v876_v24, %v874_v23  ;;  %v1021_v23 = vstv %s1502_s24  ;;  %s238_s24 = scalar_lea.vmem %s2338_s5, %s1514_s26 }
 0x4fe   : > { %v881_v33 = vmul.f32 %v878_v28, %v1741_v30  ;;  %v882_v34 = vmul.f32 %v877_v25, %v1746_v31 }
 0x4ff   : > { %v888_v35 = vpop.permute.xlu0 %887 }
 0x500   : > { %v955_v36 = vpack.c.bf16 %v881_v33, %v869_v29  ;;  %v890_v37 = vpop.permute.xlu1 %889  ;;  %v956_v42 = vpack.c.bf16 %v882_v34, %v870_v32 }
 0x501   : > { %v891_v43 = vsel %vm304_vm4, %v888_v35, %v890_v37  ;;  %v892_v44 = vsel %vm304_vm4, %v890_v37, %v888_v35 }
 0x502   : > { %v895_v45 = vmul.f32 %v891_v43, %v1760_v40  ;;  %v896_v46 = vmul.f32 %v892_v44, %v1765_v41  ;;  %979 = vmatprep.subr.bf16.mxu1 %v956_v42 }
 0x503   : > { %980 = vmatpush1.bf16.msra.mxu1 %v955_v36  ;;  %v900_v47 = vpop.permute.xlu0 %899 }
 0x504   : > { %v957_v48 = vpack.c.bf16 %v895_v45, %v2015_v60  ;;  %v902_v49 = vpop.permute.xlu1 %901  ;;  %v958_v50 = vpack.c.bf16 %v896_v46, %v2018_v61 }
 0x505   : > { %v903_v51 = vsel %vm317_vm5, %v900_v47, %v902_v49  ;;  %v904_v52 = vsel %vm317_vm5, %v902_v49, %v900_v47 }
 0x506   : > { %981 = vmatprep.subr.bf16.mxu1 %v958_v50  ;;  %v907_v39 = vmul.f32 %v903_v51, %v1779_v54  ;;  %v908_v62 = vmul.f32 %v904_v52, %v1785_v55 }
 0x507   : > { %982 = vmatpush1.bf16.msra.mxu1 %v957_v48  ;;  %v912_v53 = vpop.permute.xlu0 %911 }
 0x508   : > { %v914_v56 = vpop.permute.xlu1 %913 }
 0x509   : > { %v915_v57 = vsel %vm330_vm6, %v912_v53, %v914_v56  ;;  %v916_v38 = vsel %vm330_vm6, %v914_v56, %v912_v53 }
 0x50a   : > { %v919_v63 = vmul.f32 %v915_v57, %v1794_v58  ;;  %v920_v0 = vmul.f32 %v916_v38, %v1799_v59 }
 0x50b   : > { %v924_v1 = vpop.permute.xlu0 %923 }
 0x50c   : > { %v959_v3 = vpack.c.bf16 %v919_v63, %v907_v39  ;;  %v926_v4 = vpop.permute.xlu1 %925  ;;  %v960_v12 = vpack.c.bf16 %v920_v0, %v908_v62 }
 0x50d   : > { %v927_v13 = vsel %vm343_vm7, %v924_v1, %v926_v4  ;;  %v928_v14 = vsel %vm343_vm7, %v926_v4, %v924_v1 }
 0x50e   : > { %v931_v15 = vmul.f32 %v927_v13, %v1813_v6  ;;  %v932_v16 = vmul.f32 %v928_v14, %v1818_v7  ;;  %983 = vmatprep.subr.bf16.mxu1 %v960_v12 }
 0x50f   : > { %984 = vmatpush1.bf16.msra.mxu1 %v959_v3 }
 0x510   : > { %v961_v19 = vpack.c.bf16 %v931_v15, %v931_v15  ;;  %v962_v20 = vpack.c.bf16 %v932_v16, %v932_v16 }
 0x512   : > { %1500 = vmatprep.subr.msk.bf16.mxu1 %vm389_vm8, %v962_v20  ;;  %v972_v21 = vsel %vm389_vm8, %v961_v19, 0 }
 0x513   : > { %986 = vmatpush1.bf16.msra.mxu1 %v972_v21 }
 0x516   : > { %1501 = vmatmul.mubr.msk.bf16.vlgmr.msra.gmra.mrb[4].mxu1 %vm385_vm9, %v1498_v17 }
 0x517   : > { %1397 = vmatprep.mubr.bf16.mxu1 %v1580_v2  ;;  %v1504_v2 = vld [vmem:[%s2335_s2 + $0x20] sm:$0xff] }
 0x51c   : > { %v966_v18 = vpop.permute.xlu0 %965 }
 0x5e9   : > { %v1011_v22 = vpop.f32.mrb[4].mxu1 }
 0x5ea   : > { %v1012_v24 = vadd.f32 %v1011_v22, %v966_v18  ;;  %v1013_v25 = vpop.f32.mrb[5].mxu1 }
 0x5eb   : > { %v1014_v28 = vadd.f32 %v1013_v25, %v966_v18  ;;  %v1015_v29 = vpop.f32.mrb[6].mxu1 }
 0x5ec   : > { %vm1019_vm10 = vcmp.ge.f32.partialorder %v1012_v24, 0.0  ;;  %v1022_v32 = vmul.f32 %v1021_v23, %v1012_v24  ;;  %v1016_v33 = vpop.f32.mrb[7].mxu1 }
 0x5ed   : > { %vm1020_vm11 = vcmp.ge.f32.partialorder %v1014_v28, 0.0  ;;  %v1023_v34 = vmul.f32 %v1021_v23, %v1014_v28 }
 0x5ee   : > { %v2112_v35 = vsel %vm1019_vm10, %v1012_v24, %v1022_v32 }
 0x5ef   : > { %v1025_v36 = vsel %vm1020_vm11, %v1014_v28, %v1023_v34  ;;  %1030 = vrot.lane.b32.xlu1 %v2112_v35, %s1575_s6 }
 0x5f0   : > { %1032 = vrot.lane.b32.xlu0 %v1025_v36, %s1575_s6 }
 0x5f3   : > { %1042 = vrot.lane.b32.xlu1 %v2112_v35, %s1574_s30 }
 0x5f4   : > { %1044 = vrot.lane.b32.xlu0 %v1025_v36, %s1574_s30 }
 0x5f7   : > { %1054 = vrot.lane.b32.xlu1 %v2112_v35, %s1576_s7 }
 0x5f8   : > { %1056 = vrot.lane.b32.xlu0 %v1025_v36, %s1576_s7 }
 0x5fb   : > { %1066 = vrot.lane.b32.xlu1 %v2112_v35, %s1577_s8 }
 0x5fc   : > { %1068 = vrot.lane.b32.xlu0 %v1025_v36, %s1577_s8 }
 0x5ff   : > { %1080 = vrot.lane.b32.xlu1 %v2112_v35, %s1578_s9 }
 0x600   : > { %1082 = vrot.lane.b32.xlu0 %v1025_v36, %s1578_s9 }
 0x603   : > { %1092 = vrot.lane.b32.xlu1 %v2112_v35, %s1579_s10 }
 0x604   : > { %1094 = vrot.lane.b32.xlu0 %v1025_v36, %s1579_s10 }
 0x607   : > { %1104 = vrot.lane.b32.xlu1 %v2112_v35, %s1581_s11 }
 0x608   : > { %1106 = vrot.lane.b32.xlu0 %v1025_v36, %s1581_s11 }
 0x60b   : > { %1116 = vrot.lane.b32.xlu1 %v2112_v35, %s1582_s12 }
 0x60c   : > { %1118 = vrot.lane.b32.xlu0 %v1025_v36, %s1582_s12 }
 0x60f   : > { %1158 = vperm.xlu1 %1545, %v1504_v2  }
 0x661   : > { %v1031_v37 = vpop.permute.xlu1 %1030 }
 0x662   : > { %v1033_v42 = vpop.permute.xlu0 %1032 }
 0x663   : > { %v1034_v43 = vsel %vm250_vm1, %v1031_v37, %v1033_v42  ;;  %v1035_v44 = vsel %vm250_vm1, %v1033_v42, %v1031_v37  ;;  %v1503_v37 = vld [vmem:[%s2334_s1 + $0x10] sm:$0xf] }
 0x664   : > { %v1038_v49 = vmul.f32 %v1035_v44, %v1703_v10  ;;  %v1039_v50 = vmul.f32 %v1034_v43, %v1693_v8  ;;  %v1214_v43 = vstv %s1507_s13 }
 0x665   : > { %v1043_v45 = vpop.permute.xlu1 %1042 }
 0x666   : > { %v1045_v46 = vpop.permute.xlu0 %1044 }
 0x667   : > { %v1046_v47 = vsel %vm263_vm0, %v1043_v45, %v1045_v46  ;;  %v1047_v48 = vsel %vm263_vm0, %v1045_v46, %v1043_v45 }
 0x668   : > { %v1050_v51 = vmul.f32 %v1047_v48, %v1708_v11  ;;  %v1051_v52 = vmul.f32 %v1046_v47, %v1698_v9 }
 0x669   : > { %v1055_v53 = vpop.permute.xlu1 %1054 }
 0x66a   : > { %v1146_v56 = vpack.c.bf16 %v1050_v51, %v1038_v49  ;;  %v1057_v57 = vpop.permute.xlu0 %1056  ;;  %v1147_v38 = vpack.c.bf16 %v1051_v52, %v1039_v50 }
 0x66b   : > { %v1058_v39 = vsel %vm276_vm2, %v1055_v53, %v1057_v57  ;;  %v1059_v62 = vsel %vm276_vm2, %v1057_v57, %v1055_v53  ;;  %v1231_v57 = vld [vmem:[%s2337_s4] sm:$0xff] }
 0x66c   : > { %1170 = vmatprep.subr.bf16.mxu0 %v1147_v38  ;;  %v1062_v11 = vmul.f32 %v1059_v62, %v1726_v26  ;;  %v1063_v0 = vmul.f32 %v1058_v39, %v1732_v27  ;;  %v1232_v38 = vld [vmem:[%s2337_s4 + $0x8] sm:$0xff] }
 0x66d   : > { %1171 = vmatpush1.bf16.msra.mxu0 %v1146_v56  ;;  %v1067_v63 = vpop.permute.xlu1 %1066 }
 0x66e   : > { %v1069_v10 = vpop.permute.xlu0 %1068 }
 0x66f   : > { %v1070_v8 = vsel %vm289_vm3, %v1067_v63, %v1069_v10  ;;  %v1071_v9 = vsel %vm289_vm3, %v1069_v10, %v1067_v63  ;;  %v1243_v10 = vld [vmem:[%s2337_s4 + $0x10] sm:$0xff] }
 0x670   : > { %v1074_v1 = vmul.f32 %v1071_v9, %v1741_v30  ;;  %v1075_v3 = vmul.f32 %v1070_v8, %v1746_v31  ;;  %v1244_v8 = vld [vmem:[%s2337_s4 + $0x18] sm:$0xff] }
 0x671   : > { %v1081_v4 = vpop.permute.xlu1 %1080 }
 0x672   : > { %v1148_v12 = vpack.c.bf16 %v1074_v1, %v1062_v11  ;;  %v1083_v13 = vpop.permute.xlu0 %1082  ;;  %v1149_v14 = vpack.c.bf16 %v1075_v3, %v1063_v0 }
 0x673   : > { %v1084_v15 = vsel %vm304_vm4, %v1081_v4, %v1083_v13  ;;  %v1085_v16 = vsel %vm304_vm4, %v1083_v13, %v1081_v4 }
 0x674   : > { %v1088_v19 = vmul.f32 %v1084_v15, %v1760_v40  ;;  %v1089_v26 = vmul.f32 %v1085_v16, %v1765_v41  ;;  %1172 = vmatprep.subr.bf16.mxu0 %v1149_v14 }
 0x675   : > { %1173 = vmatpush1.bf16.msra.mxu0 %v1148_v12  ;;  %v1093_v27 = vpop.permute.xlu1 %1092 }
 0x676   : > { %v1150_v30 = vpack.c.bf16 %v1088_v19, %v2112_v35  ;;  %v1095_v31 = vpop.permute.xlu0 %1094  ;;  %v1151_v20 = vpack.c.bf16 %v1089_v26, %v1025_v36  ;;  %v1255_v19 = vld [vmem:[%s2337_s4 + $0x20] sm:$0xff]  ;;  %v1256_v26 = vld [vmem:[%s2337_s4 + $0x28] sm:$0xff] }
 0x677   : > { %v1096_v21 = vsel %vm317_vm5, %v1093_v27, %v1095_v31  ;;  %v1097_v17 = vsel %vm317_vm5, %v1095_v31, %v1093_v27 }
 0x678   : > { %1174 = vmatprep.subr.bf16.mxu0 %v1151_v20  ;;  %v1100_v23 = vmul.f32 %v1096_v21, %v1779_v54  ;;  %v1101_v24 = vmul.f32 %v1097_v17, %v1785_v55  ;;  %v1267_v20 = vld [vmem:[%s2337_s4 + $0x30] sm:$0xff]  ;;  %v1268_v21 = vld [vmem:[%s2337_s4 + $0x38] sm:$0xff] }
 0x679   : > { %1175 = vmatpush1.bf16.msra.mxu0 %v1150_v30  ;;  %v1105_v18 = vpop.permute.xlu1 %1104 }
 0x67a   : > { %v1107_v22 = vpop.permute.xlu0 %1106 }
 0x67b   : > { %v1108_v40 = vsel %vm330_vm6, %v1105_v18, %v1107_v22  ;;  %v1109_v41 = vsel %vm330_vm6, %v1107_v22, %v1105_v18 }
 0x67c   : > { %v1112_v25 = vmul.f32 %v1108_v40, %v1794_v58  ;;  %v1113_v28 = vmul.f32 %v1109_v41, %v1799_v59 }
 0x67d   : > { %v1117_v29 = vpop.permute.xlu1 %1116 }
 0x67e   : > { %v1152_v32 = vpack.c.bf16 %v1112_v25, %v1100_v23  ;;  %v1119_v33 = vpop.permute.xlu0 %1118  ;;  %v1153_v34 = vpack.c.bf16 %v1113_v28, %v1101_v24  ;;  %v1281_v28 = vld [vmem:[%s2337_s4 + $0x50] sm:$0xff] }
 0x67f   : > { %v1120_v35 = vsel %vm343_vm7, %v1117_v29, %v1119_v33  ;;  %v1121_v36 = vsel %vm343_vm7, %v1119_v33, %v1117_v29  ;;  %v1282_v29 = vld [vmem:[%s2337_s4 + $0x58] sm:$0xff] }
 0x680   : > { %v1124_v2 = vmul.f32 %v1120_v35, %v1813_v6  ;;  %v1125_v54 = vmul.f32 %v1121_v36, %v1818_v7  ;;  %1176 = vmatprep.subr.bf16.mxu0 %v1153_v34 }
 0x681   : > { %1177 = vmatpush1.bf16.msra.mxu0 %v1152_v32 }
 0x682   : > { %v1154_v55 = vpack.c.bf16 %v1124_v2, %v1124_v2  ;;  %v1155_v58 = vpack.c.bf16 %v1125_v54, %v1125_v54 }
 0x684   : > { %1505 = vmatprep.subr.msk.bf16.mxu0 %vm389_vm8, %v1155_v58  ;;  %v1165_v59 = vsel %vm389_vm8, %v1154_v55, 0 }
 0x685   : > { %1179 = vmatpush1.bf16.msra.mxu0 %v1165_v59 }
 0x688   : > { %1506 = vmatmul.mubr.msk.bf16.vlgmr.msra.gmra.mrb[8].mxu0 %vm385_vm9, %v1503_v37 }
 0x68e   : > { %v1159_v42 = vpop.permute.xlu1 %1158 }
 0x75b   : > { %v1204_v6 = vpop.f32.mrb[8].mxu0 }
 0x75c   : > { %v1205_v7 = vadd.f32 %v1204_v6, %v1159_v42  ;;  %v1206_v44 = vpop.f32.mrb[9].mxu0  ;;  %v1294_v6 = vld [vmem:[%s2337_s4 + $0x68] sm:$0xff] }
 0x75d   : > { %v1207_v45 = vadd.f32 %v1206_v44, %v1159_v42  ;;  %v1208_v46 = vpop.f32.mrb[10].mxu0  ;;  %v1293_v42 = vld [vmem:[%s2337_s4 + $0x60] sm:$0xff] }
 0x75e   : > { %vm1212_vm12 = vcmp.ge.f32.partialorder %v1205_v7, 0.0  ;;  %v1215_v47 = vmul.f32 %v1214_v43, %v1205_v7  ;;  %v1209_v48 = vpop.f32.mrb[11].mxu0  ;;  %v1306_v46 = vld [vmem:[%s2337_s4 + $0x78] sm:$0xff] }
 0x75f   : > { %vm1213_vm13 = vcmp.ge.f32.partialorder %v1207_v45, 0.0  ;;  %v1216_v49 = vmul.f32 %v1214_v43, %v1207_v45 }
 0x760   : > { %v1217_v50 = vsel %vm1212_vm12, %v1205_v7, %v1215_v47 }
 0x761   : > { %v2197_v51 = vadd.f32 %v1217_v50, %v2015_v60  ;;  %v1218_v52 = vsel %vm1213_vm13, %v1207_v45, %v1216_v49  ;;  %v1509_v60 = vld [vmem:[%s2335_s2 + $0x28] sm:$0xff]  ;;  %v1305_v45 = vld [vmem:[%s2337_s4 + $0x70] sm:$0xff] }
 0x762   : > { %v2200_v53 = vadd.f32 %v1218_v52, %v2018_v61 }
 0x763   : > { %1225 = vrot.lane.b32.xlu0 %v2197_v51, %s1575_s6 }
 0x764   : > { %1227 = vrot.lane.b32.xlu1 %v2200_v53, %s1575_s6 }
 0x767   : > { %1237 = vrot.lane.b32.xlu0 %v2197_v51, %s1574_s30 }
 0x768   : > { %1239 = vrot.lane.b32.xlu1 %v2200_v53, %s1574_s30 }
 0x76b   : > { %1249 = vrot.lane.b32.xlu0 %v2197_v51, %s1576_s7 }
 0x76c   : > { %1251 = vrot.lane.b32.xlu1 %v2200_v53, %s1576_s7 }
 0x76f   : > { %1261 = vrot.lane.b32.xlu0 %v2197_v51, %s1577_s8 }
 0x770   : > { %1263 = vrot.lane.b32.xlu1 %v2200_v53, %s1577_s8 }
 0x773   : > { %1275 = vrot.lane.b32.xlu0 %v2197_v51, %s1578_s9 }
 0x774   : > { %1277 = vrot.lane.b32.xlu1 %v2200_v53, %s1578_s9 }
 0x777   : > { %1287 = vrot.lane.b32.xlu0 %v2197_v51, %s1579_s10 }
 0x778   : > { %1289 = vrot.lane.b32.xlu1 %v2200_v53, %s1579_s10 }
 0x77b   : > { %1299 = vrot.lane.b32.xlu0 %v2197_v51, %s1581_s11 }
 0x77c   : > { %1301 = vrot.lane.b32.xlu1 %v2200_v53, %s1581_s11 }
 0x77f   : > { %1311 = vrot.lane.b32.xlu0 %v2197_v51, %s1582_s12 }
 0x780   : > { %1313 = vrot.lane.b32.xlu1 %v2200_v53, %s1582_s12 }
 0x783   : > { %1353 = vperm.xlu0 %1544, %v1509_v60  }
 0x7d5   : > { %v1226_v61 = vpop.permute.xlu0 %1225 }
 0x7d6   : > { %v1228_v56 = vpop.permute.xlu1 %1227 }
 0x7d7   : > { %v1229_v39 = vsel %vm250_vm1, %v1226_v61, %v1228_v56  ;;  %v1230_v62 = vsel %vm250_vm1, %v1228_v56, %v1226_v61  ;;  %v1317_v61 = vld [vmem:[%s2337_s4 + $0x80] sm:$0xff]  ;;  %v1318_v56 = vld [vmem:[%s2337_s4 + $0x88] sm:$0xff] }
 0x7d8   : > { %v1233_v1 = vmul.f32 %v1231_v57, %v1230_v62  ;;  %v1234_v3 = vmul.f32 %v1232_v38, %v1229_v39 }
 0x7d9   : > { %v1238_v63 = vpop.permute.xlu0 %1237 }
 0x7da   : > { %v1240_v9 = vpop.permute.xlu1 %1239 }
 0x7db   : > { %v1241_v11 = vsel %vm263_vm0, %v1238_v63, %v1240_v9  ;;  %v1242_v0 = vsel %vm263_vm0, %v1240_v9, %v1238_v63 }
 0x7dc   : > { %v1245_v4 = vmul.f32 %v1243_v10, %v1242_v0  ;;  %v1246_v12 = vmul.f32 %v1244_v8, %v1241_v11 }
 0x7dd   : > { %v1250_v13 = vpop.permute.xlu0 %1249 }
 0x7de   : > { %v1341_v14 = vpack.c.bf16 %v1245_v4, %v1233_v1  ;;  %v1252_v15 = vpop.permute.xlu1 %1251  ;;  %v1342_v16 = vpack.c.bf16 %v1246_v12, %v1234_v3  ;;  %v1508_v1 = vld [vmem:[%s2334_s1 + $0x14] sm:$0xf] }
 0x7df   : > { %v1253_v27 = vsel %vm276_vm2, %v1250_v13, %v1252_v15  ;;  %v1254_v30 = vsel %vm276_vm2, %v1252_v15, %v1250_v13 }
 0x7e0   : > { %1365 = vmatprep.subr.bf16.mxu1 %v1342_v16  ;;  %v1257_v40 = vmul.f32 %v1255_v19, %v1254_v30  ;;  %v1258_v41 = vmul.f32 %v1256_v26, %v1253_v27 }
 0x7e1   : > { %1366 = vmatpush1.bf16.msra.mxu1 %v1341_v14  ;;  %v1262_v31 = vpop.permute.xlu0 %1261 }
 0x7e2   : > { %v1264_v17 = vpop.permute.xlu1 %1263 }
 0x7e3   : > { %v1265_v18 = vsel %vm289_vm3, %v1262_v31, %v1264_v17  ;;  %v1266_v22 = vsel %vm289_vm3, %v1264_v17, %v1262_v31 }
 0x7e4   : > { %v1269_v23 = vmul.f32 %v1267_v20, %v1266_v22  ;;  %v1270_v24 = vmul.f32 %v1268_v21, %v1265_v18 }
 0x7e5   : > { %v1276_v25 = vpop.permute.xlu0 %1275 }
 0x7e6   : > { %v1343_v32 = vpack.c.bf16 %v1269_v23, %v1257_v40  ;;  %v1278_v33 = vpop.permute.xlu1 %1277  ;;  %v1344_v34 = vpack.c.bf16 %v1270_v24, %v1258_v41 }
 0x7e7   : > { %v1279_v35 = vsel %vm304_vm4, %v1276_v25, %v1278_v33  ;;  %v1280_v36 = vsel %vm304_vm4, %v1278_v33, %v1276_v25 }
 0x7e8   : > { %v1283_v2 = vmul.f32 %v1281_v28, %v1279_v35  ;;  %v1284_v54 = vmul.f32 %v1282_v29, %v1280_v36  ;;  %1367 = vmatprep.subr.bf16.mxu1 %v1344_v34 }
 0x7e9   : > { %1368 = vmatpush1.bf16.msra.mxu1 %v1343_v32  ;;  %v1288_v55 = vpop.permute.xlu0 %1287 }
 0x7ea   : > { %v1345_v58 = vpack.c.bf16 %v1283_v2, %v2197_v51  ;;  %v1290_v59 = vpop.permute.xlu1 %1289  ;;  %v1346_v37 = vpack.c.bf16 %v1284_v54, %v2200_v53 }
 0x7eb   : > { %v1291_v43 = vsel %vm317_vm5, %v1288_v55, %v1290_v59  ;;  %v1292_v7 = vsel %vm317_vm5, %v1290_v59, %v1288_v55 }
 0x7ec   : > { %1369 = vmatprep.subr.bf16.mxu1 %v1346_v37  ;;  %v1295_v50 = vmul.f32 %v1293_v42, %v1291_v43  ;;  %v1296_v51 = vmul.f32 %v1294_v6, %v1292_v7 }
 0x7ed   : > { %1370 = vmatpush1.bf16.msra.mxu1 %v1345_v58  ;;  %v1300_v44 = vpop.permute.xlu0 %1299 }
 0x7ee   : > { %v1302_v47 = vpop.permute.xlu1 %1301 }
 0x7ef   : > { %v1303_v48 = vsel %vm330_vm6, %v1300_v44, %v1302_v47  ;;  %v1304_v49 = vsel %vm330_vm6, %v1302_v47, %v1300_v44 }
 0x7f0   : > { %v1307_v52 = vmul.f32 %v1305_v45, %v1303_v48  ;;  %v1308_v53 = vmul.f32 %v1306_v46, %v1304_v49 }
 0x7f1   : > { %v1312_v60 = vpop.permute.xlu0 %1311 }
 0x7f2   : > { %v1347_v57 = vpack.c.bf16 %v1307_v52, %v1295_v50  ;;  %v1314_v38 = vpop.permute.xlu1 %1313  ;;  %v1348_v39 = vpack.c.bf16 %v1308_v53, %v1296_v51 }
 0x7f3   : > { %v1315_v62 = vsel %vm343_vm7, %v1312_v60, %v1314_v38  ;;  %v1316_v63 = vsel %vm343_vm7, %v1314_v38, %v1312_v60 }
 0x7f4   : > { %v1319_v10 = vmul.f32 %v1317_v61, %v1315_v62  ;;  %v1320_v8 = vmul.f32 %v1318_v56, %v1316_v63  ;;  %1371 = vmatprep.subr.bf16.mxu1 %v1348_v39 }
 0x7f5   : > { %1372 = vmatpush1.bf16.msra.mxu1 %v1347_v57 }
 0x7f6   : > { %v1349_v9 = vpack.c.bf16 %v1319_v10, %v1319_v10  ;;  %v1350_v11 = vpack.c.bf16 %v1320_v8, %v1320_v8 }
 0x7f8   : > { %1510 = vmatprep.subr.msk.bf16.mxu1 %vm389_vm8, %v1350_v11  ;;  %v1360_v0 = vsel %vm389_vm8, %v1349_v9, 0 }
 0x7f9   : > { %1374 = vmatpush1.bf16.msra.mxu1 %v1360_v0 }
 0x7fc   : > { %1511 = vmatmul.mubr.msk.bf16.vlgmr.msra.gmra.mrb[8].mxu1 %vm385_vm9, %v1508_v1 }
 0x802   : > { %v1354_v3 = vpop.permute.xlu0 %1353 }
 0x8cf   : > { %v1399_v5 = vpop.f32.mrb[8].mxu1 }
 0x8d0   : > { %v1400_v4 = vadd.f32 %v1399_v5, %v1354_v3  ;;  %v1401_v12 = vpop.f32.mrb[9].mxu1 }
 0x8d1   : > { %v1402_v13 = vadd.f32 %v1401_v12, %v1354_v3  ;;  %v1403_v14 = vpop.f32.mrb[10].mxu1 }
 0x8d2   : > { %1406 = vst [vmem:[%s238_s24] sm:$0xff] %v1400_v4  ;;  %v1404_v15 = vpop.f32.mrb[11].mxu1 }
 0x8d3   : > { %1407 = vst [vmem:[%s238_s24 + $0x8] sm:$0xff] %v1402_v13 }
 0x8d4 PF: > { %s16_s18 = sadd.s32 1, %s1571_s18  }
 0x8d5   : > { %p13_p1 = scmp.ge.s32.totalorder %s16_s18, 4  }
 0x8d7   :  { %15 = sbr.rel (!%p13_p1) target bundleno = 1 (0x1), region = 85 }
 0x8de   :  { %1429 = vsyncpa [#allocation4], 1 }
 0x8df   :  { %1431 = vsyncpa [#allocation4 + $0x1], 1 }

</bundles_post_ra>
